<compile_context>
chip_gen: v7x
topology: tpu7x:2x2x1
jax: 0.10.0
libtpu: 0.0.40
codegen_flags: <defaults>
</compile_context>

<pallas_src>
import math
import functools

import jax
import jax.numpy as jnp
from jax import lax
from jax.experimental import pallas as pl
from jax.experimental.pallas import tpu as pltpu


# ------------------------------ kernel helpers -------------------------------

def _layernorm(x, g, b, eps):
    # f32 statistics (keep f32 even though matmul inputs are bf16)
    mu = jnp.mean(x, axis=-1, keepdims=True)
    xc = x - mu
    var = jnp.mean(xc * xc, axis=-1, keepdims=True)
    return xc * lax.rsqrt(var + eps) * g + b


def _gelu_new(y):
    # HF "gelu_new" (tanh approximation), f32
    return 0.5 * y * (1.0 + jnp.tanh(
        math.sqrt(2.0 / math.pi) * (y + 0.044715 * (y * y * y))))


# ------------------------------ fused kernel ---------------------------------

def _gpt2_fused_kernel(h0_ref, km_ref,
                       ln1g_ref, ln1b_ref, wqkv_ref, bqkv_ref,
                       wpr_ref, bpr_ref, ln2g_ref, ln2b_ref,
                       wfc_ref, bfc_ref, wmp_ref, bmp_ref,
                       lnfg_ref, lnfb_ref,
                       o_ref, attn_ref, *, BT, S, H, Dh, eps):
    """One grid step = one (batch_tile, layer) pair.

    o_ref    : [BT*S, D] residual stream, resident in VMEM across the layer axis
    attn_ref : [BT*S, D] VMEM scratch — per-head outputs land at final offsets
    """
    D = H * Dh
    l = pl.program_id(1)
    last = pl.num_programs(1) - 1
    scale = 1.0 / math.sqrt(Dh)
    neg = jnp.finfo(jnp.float32).min

    # Initialize the resident residual stream from the embeddings at layer 0.
    # (Output blocks are write-only windows; the h0->out HBM alias only saves
    #  the extra HBM allocation, not this init.)
    @pl.when(l == 0)
    def _():
        o_ref[...] = h0_ref[...]

    h = o_ref[...]                                    # [NT, D] f32

    # ----------------------- attention sub-block ----------------------------
    x = _layernorm(h, ln1g_ref[...], ln1b_ref[...], eps)
    qkv = jnp.dot(x.astype(jnp.bfloat16), wqkv_ref[...],
                  preferred_element_type=jnp.float32) + bqkv_ref[...]  # [NT, 3D]

    # Causal template built once per step (VPU iota/compare — hides under MXU).
    row = lax.broadcasted_iota(jnp.int32, (S, S), 0)
    col = lax.broadcasted_iota(jnp.int32, (S, S), 1)
    causal_ok = col <= row                             # [S, S] bool

    # Small static loops over batches-in-tile and heads; each head result is
    # stored straight into attn_ref at its final lane offset (no concat).
    # TODO(synk): switch the head loop to lax.fori_loop(..., unroll=True) with
    # pl.ds lane offsets once H grows well beyond 4.
    for b in range(BT):
        gb = pl.program_id(0) * BT + b                 # global batch index
        kvalid = km_ref[pl.ds(gb, 1), :] > 0.5         # [1, S] key-valid row
        madd = jnp.where(jnp.logical_and(causal_ok, kvalid), 0.0, neg)  # [S, S]
        qkv_b = qkv[b * S:(b + 1) * S, :]              # [S, 3D]
        for hh in range(H):
            q = qkv_b[:, hh * Dh:(hh + 1) * Dh].astype(jnp.bfloat16)
            k = qkv_b[:, D + hh * Dh:D + (hh + 1) * Dh].astype(jnp.bfloat16)
            v = qkv_b[:, 2 * D + hh * Dh:2 * D + (hh + 1) * Dh].astype(jnp.bfloat16)
            # QK^T without materializing a transpose of K
            s = lax.dot_general(q, k, (((1,), (1,)), ((), ())),
                                preferred_element_type=jnp.float32) * scale
            s = s + madd                               # causal + padding mask
            smax = jnp.max(s, axis=-1, keepdims=True)
            e = jnp.exp(s - smax)
            p = e * pl.reciprocal(jnp.sum(e, axis=-1, keepdims=True), approx=True)
            attn_ref[b * S:(b + 1) * S, hh * Dh:(hh + 1) * Dh] = jnp.dot(
                p.astype(jnp.bfloat16), v, preferred_element_type=jnp.float32)

    # c_proj with fused residual add (read the merged-head slab once)
    attn = jnp.dot(attn_ref[...].astype(jnp.bfloat16), wpr_ref[...],
                   preferred_element_type=jnp.float32) + bpr_ref[...]
    h = h + attn

    # -------------------------- MLP sub-block -------------------------------
    x = _layernorm(h, ln2g_ref[...], ln2b_ref[...], eps)
    y = jnp.dot(x.astype(jnp.bfloat16), wfc_ref[...],
                preferred_element_type=jnp.float32) + bfc_ref[...]
    y = _gelu_new(y)                                   # f32 epilogue
    y = jnp.dot(y.astype(jnp.bfloat16), wmp_ref[...],
                preferred_element_type=jnp.float32) + bmp_ref[...]
    h = h + y                                          # fused residual add

    o_ref[...] = h                                     # keep resident for l+1

    # Final layernorm (ln_f) on the last layer.
    @pl.when(l == last)
    def _():
        o_ref[...] = _layernorm(h, lnfg_ref[...], lnfb_ref[...], eps)


# --------------------------- parameters / wrapper ----------------------------

def build_params(key, *, vocab, n_positions, d_model, n_layer, d_ff):
    init = 0.02
    ks = jax.random.split(key, 6)

    def nrm(k, shape):
        return init * jax.random.normal(k, shape, jnp.float32)

    return {
        # embeddings / layernorm params stay f32
        "wte": nrm(ks[0], (vocab, d_model)),
        "wpe": nrm(ks[1], (n_positions, d_model)),
        "lnf_g": jnp.ones((1, d_model), jnp.float32),
        "lnf_b": jnp.zeros((1, d_model), jnp.float32),
        "ln1_g": jnp.ones((n_layer, 1, d_model), jnp.float32),
        "ln1_b": jnp.zeros((n_layer, 1, d_model), jnp.float32),
        "ln2_g": jnp.ones((n_layer, 1, d_model), jnp.float32),
        "ln2_b": jnp.zeros((n_layer, 1, d_model), jnp.float32),
        # weight matrices in bf16 (MXU-native, halves weight DMA); biases f32
        "attn_w": nrm(ks[2], (n_layer, d_model, 3 * d_model)).astype(jnp.bfloat16),
        "attn_b": jnp.zeros((n_layer, 1, 3 * d_model), jnp.float32),
        "proj_w": nrm(ks[3], (n_layer, d_model, d_model)).astype(jnp.bfloat16),
        "proj_b": jnp.zeros((n_layer, 1, d_model), jnp.float32),
        "fc_w": nrm(ks[4], (n_layer, d_model, d_ff)).astype(jnp.bfloat16),
        "fc_b": jnp.zeros((n_layer, 1, d_ff), jnp.float32),
        "mlp_proj_w": nrm(ks[5], (n_layer, d_ff, d_model)).astype(jnp.bfloat16),
        "mlp_proj_b": jnp.zeros((n_layer, 1, d_model), jnp.float32),
    }


def gpt2_artist_forward(params, artist_ids, *, num_heads, head_dim,
                        padding_idx=0, use_pos_emb=True, eps=1e-5,
                        batch_tile=1):
    B, S = artist_ids.shape
    D = num_heads * head_dim
    N = B * S
    L = params["attn_w"].shape[0]
    F = params["fc_w"].shape[-1]

    assert B % batch_tile == 0, "batch_tile must divide batch"
    BT = batch_tile
    NT = BT * S
    assert NT % 8 == 0 and D % 128 == 0, "need lane/sublane-aligned tiles"

    # Key-validity vector (the kernel builds the causal+padding additive mask
    # in-VMEM with broadcasted_iota — no [B,S,S] mask DMA'd from HBM).
    key_valid = (artist_ids != padding_idx).astype(jnp.float32)   # [B, S]

    if use_pos_emb:
        pos_ids = jnp.broadcast_to(jnp.arange(S, dtype=jnp.int32), (B, S))
    else:
        pos_ids = jnp.zeros_like(artist_ids)

    # TODO(synk): embedding row gather stays in XLA glue; could be pulled into
    # the kernel via scalar-prefetched ids + pl.Element row gather at scale.
    h0 = (params["wte"][artist_ids] + params["wpe"][pos_ids]).reshape(N, D)
    h0 = h0.astype(jnp.float32)

    def full_block(shape):
        nd = len(shape)
        return pl.BlockSpec(shape, lambda b, l, _n=nd: (0,) * _n)

    def per_layer(shape):
        nd = len(shape)
        return pl.BlockSpec((None,) + shape,
                            lambda b, l, _n=nd: (l,) + (0,) * _n)

    in_specs = [
        pl.BlockSpec((NT, D), lambda b, l: (b, 0)),   # h0 (embeddings, per batch tile)
        full_block((B, S)),                           # key-valid vector (tiny, resident)
        per_layer((1, D)),                            # ln1_g
        per_layer((1, D)),                            # ln1_b
        per_layer((D, 3 * D)),                        # attn_w  (c_attn, Conv1D [in,out])
        per_layer((1, 3 * D)),                        # attn_b
        per_layer((D, D)),                            # proj_w  (attn c_proj)
        per_layer((1, D)),                            # proj_b
        per_layer((1, D)),                            # ln2_g
        per_layer((1, D)),                            # ln2_b
        per_layer((D, F)),                            # fc_w    (c_fc)
        per_layer((1, F)),                            # fc_b
        per_layer((F, D)),                            # mlp_proj_w (mlp c_proj)
        per_layer((1, D)),                            # mlp_proj_b
        full_block((1, D)),                           # lnf_g
        full_block((1, D)),                           # lnf_b
    ]

    out = pl.pallas_call(
        functools.partial(_gpt2_fused_kernel, BT=BT, S=S, H=num_heads,
                          Dh=head_dim, eps=eps),
        # grid = (batch tiles ["parallel" -> v7x megacore], layers [serial]);
        # layer axis is innermost so the residual stream block stays resident.
        grid=(B // BT, L),
        in_specs=in_specs,
        # block index constant along the layer axis -> output resident in VMEM
        # across all layers of a batch tile; written back when the tile changes.
        out_specs=pl.BlockSpec((NT, D), lambda b, l: (b, 0)),
        out_shape=jax.ShapeDtypeStruct((N, D), jnp.float32),
        scratch_shapes=[pltpu.VMEM((NT, D), jnp.float32)],   # merged-head slab
        # h0 and the output share an HBM buffer (saves one [N,D] f32 alloc).
        input_output_aliases={0: 0},
        compiler_params=pltpu.CompilerParams(
            dimension_semantics=("parallel", "arbitrary"),
            vmem_limit_bytes=32 * 1024 * 1024),
    )(h0, key_valid,
      params["ln1_g"], params["ln1_b"], params["attn_w"], params["attn_b"],
      params["proj_w"], params["proj_b"], params["ln2_g"], params["ln2_b"],
      params["fc_w"], params["fc_b"], params["mlp_proj_w"], params["mlp_proj_b"],
      params["lnf_g"], params["lnf_b"])

    return out.reshape(B, S, D)                       # last_hidden_state


# ---------------------------------- main --------------------------------------

if __name__ == "__main__":
    # small config consistent with the module: d_model = num_heads * head_dim
    num_layers = 2
    num_heads = 4
    head_dim = 32
    d_model = num_heads * head_dim          # 128
    num_special_tokens = 4
    num_artists = 60
    vocab = num_artists + num_special_tokens  # 64
    max_length = 16
    B, S = 2, 8

    key = jax.random.PRNGKey(0)
    k_param, k_ids = jax.random.split(key)
    params = build_params(k_param, vocab=vocab, n_positions=max_length,
                          d_model=d_model, n_layer=num_layers, d_ff=4 * d_model)

    artist_ids = jax.random.randint(k_ids, (B, S), num_special_tokens, vocab,
                                    dtype=jnp.int32)
    # introduce some padding tokens (padding_idx = 0) to exercise the mask
    artist_ids = artist_ids.at[1, -2:].set(0)

    fwd = jax.jit(functools.partial(gpt2_artist_forward,
                                    num_heads=num_heads, head_dim=head_dim,
                                    padding_idx=0, use_pos_emb=True,
                                    batch_tile=1))
    out = jax.block_until_ready(fwd(params, artist_ids))
    assert out.shape == (B, S, d_model) and out.dtype == jnp.float32
    assert bool(jnp.all(jnp.isfinite(out)))
    print("KERNEL_OK")
</pallas_src>

<mosaic_0001>
module attributes {stable_mosaic.version = 11 : i64} {
  func.func @_gpt2_fused_kernel(%arg0: i32, %arg1: i32, %arg2: memref<8x128xf32, #tpu.memory_space<vmem>>, %arg3: memref<2x8xf32, #tpu.memory_space<vmem>>, %arg4: memref<1x1x128xf32, #tpu.memory_space<vmem>>, %arg5: memref<1x1x128xf32, #tpu.memory_space<vmem>>, %arg6: memref<1x128x384xbf16, #tpu.memory_space<vmem>>, %arg7: memref<1x1x384xf32, #tpu.memory_space<vmem>>, %arg8: memref<1x128x128xbf16, #tpu.memory_space<vmem>>, %arg9: memref<1x1x128xf32, #tpu.memory_space<vmem>>, %arg10: memref<1x1x128xf32, #tpu.memory_space<vmem>>, %arg11: memref<1x1x128xf32, #tpu.memory_space<vmem>>, %arg12: memref<1x128x512xbf16, #tpu.memory_space<vmem>>, %arg13: memref<1x1x512xf32, #tpu.memory_space<vmem>>, %arg14: memref<1x512x128xbf16, #tpu.memory_space<vmem>>, %arg15: memref<1x1x128xf32, #tpu.memory_space<vmem>>, %arg16: memref<1x128xf32, #tpu.memory_space<vmem>>, %arg17: memref<1x128xf32, #tpu.memory_space<vmem>>, %arg18: memref<8x128xf32, #tpu.memory_space<vmem>>, %arg19: memref<8x128xf32, #tpu.memory_space<vmem>>) attributes {dimension_semantics = [#tpu.dimension_semantics<parallel>, #tpu.dimension_semantics<arbitrary>], iteration_bounds = array<i64: 2, 2>, scalar_prefetch = 0 : i64, scratch_operands = 1 : i64, tpu.core_type = #tpu.core_type<tc>, window_params = [{transform_indices = @transform_0, window_bounds = array<i64: 8, 128>}, {pipeline_mode = #tpu.pipeline_mode<synchronous>, transform_indices = @transform_1, window_bounds = array<i64: 2, 8>}, {transform_indices = @transform_2, window_bounds = array<i64: 1, 1, 128>}, {transform_indices = @transform_3, window_bounds = array<i64: 1, 1, 128>}, {transform_indices = @transform_4, window_bounds = array<i64: 1, 128, 384>}, {transform_indices = @transform_5, window_bounds = array<i64: 1, 1, 384>}, {transform_indices = @transform_6, window_bounds = array<i64: 1, 128, 128>}, {transform_indices = @transform_7, window_bounds = array<i64: 1, 1, 128>}, {transform_indices = @transform_8, window_bounds = array<i64: 1, 1, 128>}, {transform_indices = @transform_9, window_bounds = array<i64: 1, 1, 128>}, {transform_indices = @transform_10, window_bounds = array<i64: 1, 128, 512>}, {transform_indices = @transform_11, window_bounds = array<i64: 1, 1, 512>}, {transform_indices = @transform_12, window_bounds = array<i64: 1, 512, 128>}, {transform_indices = @transform_13, window_bounds = array<i64: 1, 1, 128>}, {pipeline_mode = #tpu.pipeline_mode<synchronous>, transform_indices = @transform_14, window_bounds = array<i64: 1, 128>}, {pipeline_mode = #tpu.pipeline_mode<synchronous>, transform_indices = @transform_15, window_bounds = array<i64: 1, 128>}, {transform_indices = @transform_16, window_bounds = array<i64: 8, 128>}]} {
    %c0_i32 = arith.constant 0 : i32
    %0 = arith.cmpi eq, %arg1, %c0_i32 : i32
    %1 = arith.extui %0 : i1 to i32
    %c0_i32_0 = arith.constant 0 : i32
    %2 = arith.cmpi ne, %1, %c0_i32_0 : i32
    scf.if %2 {
      %c0_91 = arith.constant 0 : index
      %c0_92 = arith.constant 0 : index
      %210 = vector.load %arg2[%c0_91, %c0_92] : memref<8x128xf32, #tpu.memory_space<vmem>>, vector<8x128xf32>
      %c0_93 = arith.constant 0 : index
      %c0_94 = arith.constant 0 : index
      %211 = vector.load %arg18[%c0_93, %c0_94] : memref<8x128xf32, #tpu.memory_space<vmem>>, vector<8x128xf32>
      tpu.vector_store %arg18[%c0_93, %c0_94], %210 {strides = array<i32>} : memref<8x128xf32, #tpu.memory_space<vmem>>, vector<8x128xf32>,
    } else {
    }
    %c0 = arith.constant 0 : index
    %c0_1 = arith.constant 0 : index
    %3 = vector.load %arg18[%c0, %c0_1] : memref<8x128xf32, #tpu.memory_space<vmem>>, vector<8x128xf32>
    %c0_2 = arith.constant 0 : index
    %c0_3 = arith.constant 0 : index
    %c0_4 = arith.constant 0 : index
    %4 = vector.load %arg4[%c0_2, %c0_3, %c0_4] : memref<1x1x128xf32, #tpu.memory_space<vmem>>, vector<1x1x128xf32>
    %5 = vector.shape_cast %4 : vector<1x1x128xf32> to vector<1x128xf32>
    %c0_5 = arith.constant 0 : index
    %c0_6 = arith.constant 0 : index
    %c0_7 = arith.constant 0 : index
    %6 = vector.load %arg5[%c0_5, %c0_6, %c0_7] : memref<1x1x128xf32, #tpu.memory_space<vmem>>, vector<1x1x128xf32>
    %7 = vector.shape_cast %6 : vector<1x1x128xf32> to vector<1x128xf32>
    %cst = arith.constant dense<0.000000e+00> : vector<8xf32>
    %8 = vector.multi_reduction <add>, %3, %cst [1] : vector<8x128xf32> to vector<8xf32>
    %9 = vector.shape_cast %8 : vector<8xf32> to vector<8x1xf32>
    %cst_8 = arith.constant 1.280000e+02 : f32
    %10 = vector.broadcast %cst_8 : f32 to vector<8x1xf32>
    %11 = arith.divf %9, %10 : vector<8x1xf32>
    %12 = vector.broadcast %11 : vector<8x1xf32> to vector<8x128xf32>
    %13 = arith.subf %3, %12 : vector<8x128xf32>
    %14 = arith.mulf %13, %13 : vector<8x128xf32>
    %cst_9 = arith.constant dense<0.000000e+00> : vector<8xf32>
    %15 = vector.multi_reduction <add>, %14, %cst_9 [1] : vector<8x128xf32> to vector<8xf32>
    %16 = vector.shape_cast %15 : vector<8xf32> to vector<8x1xf32>
    %cst_10 = arith.constant 1.280000e+02 : f32
    %17 = vector.broadcast %cst_10 : f32 to vector<8x1xf32>
    %18 = arith.divf %16, %17 : vector<8x1xf32>
    %cst_11 = arith.constant 9.99999974E-6 : f32
    %19 = vector.broadcast %cst_11 : f32 to vector<8x1xf32>
    %20 = arith.addf %18, %19 : vector<8x1xf32>
    %21 = math.rsqrt %20 : vector<8x1xf32>
    %22 = vector.broadcast %21 : vector<8x1xf32> to vector<8x128xf32>
    %23 = arith.mulf %13, %22 : vector<8x128xf32>
    %24 = vector.broadcast %5 : vector<1x128xf32> to vector<8x128xf32>
    %25 = arith.mulf %23, %24 : vector<8x128xf32>
    %26 = vector.broadcast %7 : vector<1x128xf32> to vector<8x128xf32>
    %27 = arith.addf %25, %26 : vector<8x128xf32>
    %28 = arith.truncf %27 : vector<8x128xf32> to vector<8x128xbf16>
    %c0_12 = arith.constant 0 : index
    %c0_13 = arith.constant 0 : index
    %c0_14 = arith.constant 0 : index
    %29 = vector.load %arg6[%c0_12, %c0_13, %c0_14] : memref<1x128x384xbf16, #tpu.memory_space<vmem>>, vector<1x128x384xbf16>
    %30 = vector.shape_cast %29 : vector<1x128x384xbf16> to vector<128x384xbf16>
    %cst_15 = arith.constant dense<0.000000e+00> : vector<8x384xf32>
    %31 = tpu.matmul %28, %30, %cst_15 {dimension_numbers = #tpu.dot_dimension_numbers<[1], [0], [0], [1], [0, 0, 1, 1], [], []>} : vector<8x128xbf16>, vector<128x384xbf16>, vector<8x384xf32> -> vector<8x384xf32>
    %c0_16 = arith.constant 0 : index
    %c0_17 = arith.constant 0 : index
    %c0_18 = arith.constant 0 : index
    %32 = vector.load %arg7[%c0_16, %c0_17, %c0_18] : memref<1x1x384xf32, #tpu.memory_space<vmem>>, vector<1x1x384xf32>
    %33 = vector.shape_cast %32 : vector<1x1x384xf32> to vector<1x384xf32>
    %34 = vector.broadcast %33 : vector<1x384xf32> to vector<8x384xf32>
    %35 = arith.addf %31, %34 : vector<8x384xf32>
    %36 = tpu.iota {dimensions = array<i32: 0>} : vector<8x8xi32>
    %37 = tpu.iota {dimensions = array<i32: 1>} : vector<8x8xi32>
    %38 = arith.cmpi sle, %37, %36 : vector<8x8xi32>
    %c1_i32 = arith.constant 1 : i32
    %39 = arith.muli %arg0, %c1_i32 : i32
    %c0_i32_19 = arith.constant 0 : i32
    %40 = arith.addi %39, %c0_i32_19 : i32
    %41 = arith.index_cast %40 : i32 to index
    %c0_20 = arith.constant 0 : index
    %42 = vector.load %arg3[%41, %c0_20] : memref<2x8xf32, #tpu.memory_space<vmem>>, vector<1x8xf32>
    %cst_21 = arith.constant 5.000000e-01 : f32
    %43 = vector.broadcast %cst_21 : f32 to vector<1x8xf32>
    %44 = arith.cmpf ogt, %42, %43 : vector<1x8xf32>
    %45 = vector.broadcast %44 : vector<1x8xi1> to vector<8x8xi1>
    %46 = arith.andi %38, %45 : vector<8x8xi1>
    %cst_22 = arith.constant 0.000000e+00 : f32
    %cst_23 = arith.constant -3.40282347E+38 : f32
    %47 = vector.broadcast %cst_22 : f32 to vector<8x8xf32>
    %48 = vector.broadcast %cst_23 : f32 to vector<8x8xf32>
    %49 = arith.select %46, %47, %48 : vector<8x8xi1>, vector<8x8xf32>
    %50 = vector.extract_strided_slice %35 {offsets = [0, 0], sizes = [8, 32], strides = [1, 1]} : vector<8x384xf32> to vector<8x32xf32>
    %51 = arith.truncf %50 : vector<8x32xf32> to vector<8x32xbf16>
    %52 = vector.extract_strided_slice %35 {offsets = [0, 128], sizes = [8, 32], strides = [1, 1]} : vector<8x384xf32> to vector<8x32xf32>
    %53 = arith.truncf %52 : vector<8x32xf32> to vector<8x32xbf16>
    %54 = vector.extract_strided_slice %35 {offsets = [0, 256], sizes = [8, 32], strides = [1, 1]} : vector<8x384xf32> to vector<8x32xf32>
    %55 = arith.truncf %54 : vector<8x32xf32> to vector<8x32xbf16>
    %cst_24 = arith.constant dense<0.000000e+00> : vector<8x8xf32>
    %56 = tpu.matmul %51, %53, %cst_24 {dimension_numbers = #tpu.dot_dimension_numbers<[1], [1], [0], [0], [0, 0, 1, 0], [], []>} : vector<8x32xbf16>, vector<8x32xbf16>, vector<8x8xf32> -> vector<8x8xf32>
    %cst_25 = arith.constant 0.176776692 : f32
    %57 = vector.broadcast %cst_25 : f32 to vector<8x8xf32>
    %58 = arith.mulf %56, %57 : vector<8x8xf32>
    %59 = arith.addf %58, %49 : vector<8x8xf32>
    %cst_26 = arith.constant dense<0xFF800000> : vector<8xf32>
    %60 = vector.multi_reduction <maximumf>, %59, %cst_26 [1] : vector<8x8xf32> to vector<8xf32>
    %61 = vector.shape_cast %60 : vector<8xf32> to vector<8x1xf32>
    %62 = vector.broadcast %61 : vector<8x1xf32> to vector<8x8xf32>
    %63 = arith.subf %59, %62 : vector<8x8xf32>
    %64 = math.exp %63 : vector<8x8xf32>
    %cst_27 = arith.constant dense<0.000000e+00> : vector<8xf32>
    %65 = vector.multi_reduction <add>, %64, %cst_27 [1] : vector<8x8xf32> to vector<8xf32>
    %66 = vector.shape_cast %65 : vector<8xf32> to vector<8x1xf32>
    %67 = tpu.reciprocal %66 {approx = true} : vector<8x1xf32> -> vector<8x1xf32>
    %68 = vector.broadcast %67 : vector<8x1xf32> to vector<8x8xf32>
    %69 = arith.mulf %64, %68 : vector<8x8xf32>
    %70 = arith.truncf %69 : vector<8x8xf32> to vector<8x8xbf16>
    %cst_28 = arith.constant dense<0.000000e+00> : vector<8x32xf32>
    %71 = tpu.matmul %70, %55, %cst_28 {dimension_numbers = #tpu.dot_dimension_numbers<[1], [0], [0], [1], [0, 0, 1, 1], [], []>} : vector<8x8xbf16>, vector<8x32xbf16>, vector<8x32xf32> -> vector<8x32xf32>
    %c0_29 = arith.constant 0 : index
    %c0_30 = arith.constant 0 : index
    %72 = vector.load %arg19[%c0_29, %c0_30] : memref<8x128xf32, #tpu.memory_space<vmem>>, vector<8x32xf32>
    tpu.vector_store %arg19[%c0_29, %c0_30], %71 {strides = array<i32>} : memref<8x128xf32, #tpu.memory_space<vmem>>, vector<8x32xf32>,
    %73 = vector.extract_strided_slice %35 {offsets = [0, 32], sizes = [8, 32], strides = [1, 1]} : vector<8x384xf32> to vector<8x32xf32>
    %74 = arith.truncf %73 : vector<8x32xf32> to vector<8x32xbf16>
    %75 = vector.extract_strided_slice %35 {offsets = [0, 160], sizes = [8, 32], strides = [1, 1]} : vector<8x384xf32> to vector<8x32xf32>
    %76 = arith.truncf %75 : vector<8x32xf32> to vector<8x32xbf16>
    %77 = vector.extract_strided_slice %35 {offsets = [0, 288], sizes = [8, 32], strides = [1, 1]} : vector<8x384xf32> to vector<8x32xf32>
    %78 = arith.truncf %77 : vector<8x32xf32> to vector<8x32xbf16>
    %cst_31 = arith.constant dense<0.000000e+00> : vector<8x8xf32>
    %79 = tpu.matmul %74, %76, %cst_31 {dimension_numbers = #tpu.dot_dimension_numbers<[1], [1], [0], [0], [0, 0, 1, 0], [], []>} : vector<8x32xbf16>, vector<8x32xbf16>, vector<8x8xf32> -> vector<8x8xf32>
    %cst_32 = arith.constant 0.176776692 : f32
    %80 = vector.broadcast %cst_32 : f32 to vector<8x8xf32>
    %81 = arith.mulf %79, %80 : vector<8x8xf32>
    %82 = arith.addf %81, %49 : vector<8x8xf32>
    %cst_33 = arith.constant dense<0xFF800000> : vector<8xf32>
    %83 = vector.multi_reduction <maximumf>, %82, %cst_33 [1] : vector<8x8xf32> to vector<8xf32>
    %84 = vector.shape_cast %83 : vector<8xf32> to vector<8x1xf32>
    %85 = vector.broadcast %84 : vector<8x1xf32> to vector<8x8xf32>
    %86 = arith.subf %82, %85 : vector<8x8xf32>
    %87 = math.exp %86 : vector<8x8xf32>
    %cst_34 = arith.constant dense<0.000000e+00> : vector<8xf32>
    %88 = vector.multi_reduction <add>, %87, %cst_34 [1] : vector<8x8xf32> to vector<8xf32>
    %89 = vector.shape_cast %88 : vector<8xf32> to vector<8x1xf32>
    %90 = tpu.reciprocal %89 {approx = true} : vector<8x1xf32> -> vector<8x1xf32>
    %91 = vector.broadcast %90 : vector<8x1xf32> to vector<8x8xf32>
    %92 = arith.mulf %87, %91 : vector<8x8xf32>
    %93 = arith.truncf %92 : vector<8x8xf32> to vector<8x8xbf16>
    %cst_35 = arith.constant dense<0.000000e+00> : vector<8x32xf32>
    %94 = tpu.matmul %93, %78, %cst_35 {dimension_numbers = #tpu.dot_dimension_numbers<[1], [0], [0], [1], [0, 0, 1, 1], [], []>} : vector<8x8xbf16>, vector<8x32xbf16>, vector<8x32xf32> -> vector<8x32xf32>
    %c0_36 = arith.constant 0 : index
    %c32 = arith.constant 32 : index
    %95 = vector.load %arg19[%c0_36, %c32] : memref<8x128xf32, #tpu.memory_space<vmem>>, vector<8x32xf32>
    tpu.vector_store %arg19[%c0_36, %c32], %94 {strides = array<i32>} : memref<8x128xf32, #tpu.memory_space<vmem>>, vector<8x32xf32>,
    %96 = vector.extract_strided_slice %35 {offsets = [0, 64], sizes = [8, 32], strides = [1, 1]} : vector<8x384xf32> to vector<8x32xf32>
    %97 = arith.truncf %96 : vector<8x32xf32> to vector<8x32xbf16>
    %98 = vector.extract_strided_slice %35 {offsets = [0, 192], sizes = [8, 32], strides = [1, 1]} : vector<8x384xf32> to vector<8x32xf32>
    %99 = arith.truncf %98 : vector<8x32xf32> to vector<8x32xbf16>
    %100 = vector.extract_strided_slice %35 {offsets = [0, 320], sizes = [8, 32], strides = [1, 1]} : vector<8x384xf32> to vector<8x32xf32>
    %101 = arith.truncf %100 : vector<8x32xf32> to vector<8x32xbf16>
    %cst_37 = arith.constant dense<0.000000e+00> : vector<8x8xf32>
    %102 = tpu.matmul %97, %99, %cst_37 {dimension_numbers = #tpu.dot_dimension_numbers<[1], [1], [0], [0], [0, 0, 1, 0], [], []>} : vector<8x32xbf16>, vector<8x32xbf16>, vector<8x8xf32> -> vector<8x8xf32>
    %cst_38 = arith.constant 0.176776692 : f32
    %103 = vector.broadcast %cst_38 : f32 to vector<8x8xf32>
    %104 = arith.mulf %102, %103 : vector<8x8xf32>
    %105 = arith.addf %104, %49 : vector<8x8xf32>
    %cst_39 = arith.constant dense<0xFF800000> : vector<8xf32>
    %106 = vector.multi_reduction <maximumf>, %105, %cst_39 [1] : vector<8x8xf32> to vector<8xf32>
    %107 = vector.shape_cast %106 : vector<8xf32> to vector<8x1xf32>
    %108 = vector.broadcast %107 : vector<8x1xf32> to vector<8x8xf32>
    %109 = arith.subf %105, %108 : vector<8x8xf32>
    %110 = math.exp %109 : vector<8x8xf32>
    %cst_40 = arith.constant dense<0.000000e+00> : vector<8xf32>
    %111 = vector.multi_reduction <add>, %110, %cst_40 [1] : vector<8x8xf32> to vector<8xf32>
    %112 = vector.shape_cast %111 : vector<8xf32> to vector<8x1xf32>
    %113 = tpu.reciprocal %112 {approx = true} : vector<8x1xf32> -> vector<8x1xf32>
    %114 = vector.broadcast %113 : vector<8x1xf32> to vector<8x8xf32>
    %115 = arith.mulf %110, %114 : vector<8x8xf32>
    %116 = arith.truncf %115 : vector<8x8xf32> to vector<8x8xbf16>
    %cst_41 = arith.constant dense<0.000000e+00> : vector<8x32xf32>
    %117 = tpu.matmul %116, %101, %cst_41 {dimension_numbers = #tpu.dot_dimension_numbers<[1], [0], [0], [1], [0, 0, 1, 1], [], []>} : vector<8x8xbf16>, vector<8x32xbf16>, vector<8x32xf32> -> vector<8x32xf32>
    %c0_42 = arith.constant 0 : index
    %c64 = arith.constant 64 : index
    %118 = vector.load %arg19[%c0_42, %c64] : memref<8x128xf32, #tpu.memory_space<vmem>>, vector<8x32xf32>
    tpu.vector_store %arg19[%c0_42, %c64], %117 {strides = array<i32>} : memref<8x128xf32, #tpu.memory_space<vmem>>, vector<8x32xf32>,
    %119 = vector.extract_strided_slice %35 {offsets = [0, 96], sizes = [8, 32], strides = [1, 1]} : vector<8x384xf32> to vector<8x32xf32>
    %120 = arith.truncf %119 : vector<8x32xf32> to vector<8x32xbf16>
    %121 = vector.extract_strided_slice %35 {offsets = [0, 224], sizes = [8, 32], strides = [1, 1]} : vector<8x384xf32> to vector<8x32xf32>
    %122 = arith.truncf %121 : vector<8x32xf32> to vector<8x32xbf16>
    %123 = vector.extract_strided_slice %35 {offsets = [0, 352], sizes = [8, 32], strides = [1, 1]} : vector<8x384xf32> to vector<8x32xf32>
    %124 = arith.truncf %123 : vector<8x32xf32> to vector<8x32xbf16>
    %cst_43 = arith.constant dense<0.000000e+00> : vector<8x8xf32>
    %125 = tpu.matmul %120, %122, %cst_43 {dimension_numbers = #tpu.dot_dimension_numbers<[1], [1], [0], [0], [0, 0, 1, 0], [], []>} : vector<8x32xbf16>, vector<8x32xbf16>, vector<8x8xf32> -> vector<8x8xf32>
    %cst_44 = arith.constant 0.176776692 : f32
    %126 = vector.broadcast %cst_44 : f32 to vector<8x8xf32>
    %127 = arith.mulf %125, %126 : vector<8x8xf32>
    %128 = arith.addf %127, %49 : vector<8x8xf32>
    %cst_45 = arith.constant dense<0xFF800000> : vector<8xf32>
    %129 = vector.multi_reduction <maximumf>, %128, %cst_45 [1] : vector<8x8xf32> to vector<8xf32>
    %130 = vector.shape_cast %129 : vector<8xf32> to vector<8x1xf32>
    %131 = vector.broadcast %130 : vector<8x1xf32> to vector<8x8xf32>
    %132 = arith.subf %128, %131 : vector<8x8xf32>
    %133 = math.exp %132 : vector<8x8xf32>
    %cst_46 = arith.constant dense<0.000000e+00> : vector<8xf32>
    %134 = vector.multi_reduction <add>, %133, %cst_46 [1] : vector<8x8xf32> to vector<8xf32>
    %135 = vector.shape_cast %134 : vector<8xf32> to vector<8x1xf32>
    %136 = tpu.reciprocal %135 {approx = true} : vector<8x1xf32> -> vector<8x1xf32>
    %137 = vector.broadcast %136 : vector<8x1xf32> to vector<8x8xf32>
    %138 = arith.mulf %133, %137 : vector<8x8xf32>
    %139 = arith.truncf %138 : vector<8x8xf32> to vector<8x8xbf16>
    %cst_47 = arith.constant dense<0.000000e+00> : vector<8x32xf32>
    %140 = tpu.matmul %139, %124, %cst_47 {dimension_numbers = #tpu.dot_dimension_numbers<[1], [0], [0], [1], [0, 0, 1, 1], [], []>} : vector<8x8xbf16>, vector<8x32xbf16>, vector<8x32xf32> -> vector<8x32xf32>
    %c0_48 = arith.constant 0 : index
    %c96 = arith.constant 96 : index
    %141 = vector.load %arg19[%c0_48, %c96] : memref<8x128xf32, #tpu.memory_space<vmem>>, vector<8x32xf32>
    tpu.vector_store %arg19[%c0_48, %c96], %140 {strides = array<i32>} : memref<8x128xf32, #tpu.memory_space<vmem>>, vector<8x32xf32>,
    %c0_49 = arith.constant 0 : index
    %c0_50 = arith.constant 0 : index
    %142 = vector.load %arg19[%c0_49, %c0_50] : memref<8x128xf32, #tpu.memory_space<vmem>>, vector<8x128xf32>
    %143 = arith.truncf %142 : vector<8x128xf32> to vector<8x128xbf16>
    %c0_51 = arith.constant 0 : index
    %c0_52 = arith.constant 0 : index
    %c0_53 = arith.constant 0 : index
    %144 = vector.load %arg8[%c0_51, %c0_52, %c0_53] : memref<1x128x128xbf16, #tpu.memory_space<vmem>>, vector<1x128x128xbf16>
    %145 = vector.shape_cast %144 : vector<1x128x128xbf16> to vector<128x128xbf16>
    %cst_54 = arith.constant dense<0.000000e+00> : vector<8x128xf32>
    %146 = tpu.matmul %143, %145, %cst_54 {dimension_numbers = #tpu.dot_dimension_numbers<[1], [0], [0], [1], [0, 0, 1, 1], [], []>} : vector<8x128xbf16>, vector<128x128xbf16>, vector<8x128xf32> -> vector<8x128xf32>
    %c0_55 = arith.constant 0 : index
    %c0_56 = arith.constant 0 : index
    %c0_57 = arith.constant 0 : index
    %147 = vector.load %arg9[%c0_55, %c0_56, %c0_57] : memref<1x1x128xf32, #tpu.memory_space<vmem>>, vector<1x1x128xf32>
    %148 = vector.shape_cast %147 : vector<1x1x128xf32> to vector<1x128xf32>
    %149 = vector.broadcast %148 : vector<1x128xf32> to vector<8x128xf32>
    %150 = arith.addf %146, %149 : vector<8x128xf32>
    %151 = arith.addf %3, %150 : vector<8x128xf32>
    %c0_58 = arith.constant 0 : index
    %c0_59 = arith.constant 0 : index
    %c0_60 = arith.constant 0 : index
    %152 = vector.load %arg10[%c0_58, %c0_59, %c0_60] : memref<1x1x128xf32, #tpu.memory_space<vmem>>, vector<1x1x128xf32>
    %153 = vector.shape_cast %152 : vector<1x1x128xf32> to vector<1x128xf32>
    %c0_61 = arith.constant 0 : index
    %c0_62 = arith.constant 0 : index
    %c0_63 = arith.constant 0 : index
    %154 = vector.load %arg11[%c0_61, %c0_62, %c0_63] : memref<1x1x128xf32, #tpu.memory_space<vmem>>, vector<1x1x128xf32>
    %155 = vector.shape_cast %154 : vector<1x1x128xf32> to vector<1x128xf32>
    %cst_64 = arith.constant dense<0.000000e+00> : vector<8xf32>
    %156 = vector.multi_reduction <add>, %151, %cst_64 [1] : vector<8x128xf32> to vector<8xf32>
    %157 = vector.shape_cast %156 : vector<8xf32> to vector<8x1xf32>
    %cst_65 = arith.constant 1.280000e+02 : f32
    %158 = vector.broadcast %cst_65 : f32 to vector<8x1xf32>
    %159 = arith.divf %157, %158 : vector<8x1xf32>
    %160 = vector.broadcast %159 : vector<8x1xf32> to vector<8x128xf32>
    %161 = arith.subf %151, %160 : vector<8x128xf32>
    %162 = arith.mulf %161, %161 : vector<8x128xf32>
    %cst_66 = arith.constant dense<0.000000e+00> : vector<8xf32>
    %163 = vector.multi_reduction <add>, %162, %cst_66 [1] : vector<8x128xf32> to vector<8xf32>
    %164 = vector.shape_cast %163 : vector<8xf32> to vector<8x1xf32>
    %cst_67 = arith.constant 1.280000e+02 : f32
    %165 = vector.broadcast %cst_67 : f32 to vector<8x1xf32>
    %166 = arith.divf %164, %165 : vector<8x1xf32>
    %cst_68 = arith.constant 9.99999974E-6 : f32
    %167 = vector.broadcast %cst_68 : f32 to vector<8x1xf32>
    %168 = arith.addf %166, %167 : vector<8x1xf32>
    %169 = math.rsqrt %168 : vector<8x1xf32>
    %170 = vector.broadcast %169 : vector<8x1xf32> to vector<8x128xf32>
    %171 = arith.mulf %161, %170 : vector<8x128xf32>
    %172 = vector.broadcast %153 : vector<1x128xf32> to vector<8x128xf32>
    %173 = arith.mulf %171, %172 : vector<8x128xf32>
    %174 = vector.broadcast %155 : vector<1x128xf32> to vector<8x128xf32>
    %175 = arith.addf %173, %174 : vector<8x128xf32>
    %176 = arith.truncf %175 : vector<8x128xf32> to vector<8x128xbf16>
    %c0_69 = arith.constant 0 : index
    %c0_70 = arith.constant 0 : index
    %c0_71 = arith.constant 0 : index
    %177 = vector.load %arg12[%c0_69, %c0_70, %c0_71] : memref<1x128x512xbf16, #tpu.memory_space<vmem>>, vector<1x128x512xbf16>
    %178 = vector.shape_cast %177 : vector<1x128x512xbf16> to vector<128x512xbf16>
    %cst_72 = arith.constant dense<0.000000e+00> : vector<8x512xf32>
    %179 = tpu.matmul %176, %178, %cst_72 {dimension_numbers = #tpu.dot_dimension_numbers<[1], [0], [0], [1], [0, 0, 1, 1], [], []>} : vector<8x128xbf16>, vector<128x512xbf16>, vector<8x512xf32> -> vector<8x512xf32>
    %c0_73 = arith.constant 0 : index
    %c0_74 = arith.constant 0 : index
    %c0_75 = arith.constant 0 : index
    %180 = vector.load %arg13[%c0_73, %c0_74, %c0_75] : memref<1x1x512xf32, #tpu.memory_space<vmem>>, vector<1x1x512xf32>
    %181 = vector.shape_cast %180 : vector<1x1x512xf32> to vector<1x512xf32>
    %182 = vector.broadcast %181 : vector<1x512xf32> to vector<8x512xf32>
    %183 = arith.addf %179, %182 : vector<8x512xf32>
    %cst_76 = arith.constant 5.000000e-01 : f32
    %184 = vector.broadcast %cst_76 : f32 to vector<8x512xf32>
    %185 = arith.mulf %184, %183 : vector<8x512xf32>
    %186 = arith.mulf %183, %183 : vector<8x512xf32>
    %187 = arith.mulf %186, %183 : vector<8x512xf32>
    %cst_77 = arith.constant 4.471500e-02 : f32
    %188 = vector.broadcast %cst_77 : f32 to vector<8x512xf32>
    %189 = arith.mulf %188, %187 : vector<8x512xf32>
    %190 = arith.addf %183, %189 : vector<8x512xf32>
    %cst_78 = arith.constant 0.797884583 : f32
    %191 = vector.broadcast %cst_78 : f32 to vector<8x512xf32>
    %192 = arith.mulf %191, %190 : vector<8x512xf32>
    %193 = math.tanh %192 : vector<8x512xf32>
    %cst_79 = arith.constant 1.000000e+00 : f32
    %194 = vector.broadcast %cst_79 : f32 to vector<8x512xf32>
    %195 = arith.addf %194, %193 : vector<8x512xf32>
    %196 = arith.mulf %185, %195 : vector<8x512xf32>
    %197 = arith.truncf %196 : vector<8x512xf32> to vector<8x512xbf16>
    %c0_80 = arith.constant 0 : index
    %c0_81 = arith.constant 0 : index
    %c0_82 = arith.constant 0 : index
    %198 = vector.load %arg14[%c0_80, %c0_81, %c0_82] : memref<1x512x128xbf16, #tpu.memory_space<vmem>>, vector<1x512x128xbf16>
    %199 = vector.shape_cast %198 : vector<1x512x128xbf16> to vector<512x128xbf16>
    %cst_83 = arith.constant dense<0.000000e+00> : vector<8x128xf32>
    %200 = tpu.matmul %197, %199, %cst_83 {dimension_numbers = #tpu.dot_dimension_numbers<[1], [0], [0], [1], [0, 0, 1, 1], [], []>} : vector<8x512xbf16>, vector<512x128xbf16>, vector<8x128xf32> -> vector<8x128xf32>
    %c0_84 = arith.constant 0 : index
    %c0_85 = arith.constant 0 : index
    %c0_86 = arith.constant 0 : index
    %201 = vector.load %arg15[%c0_84, %c0_85, %c0_86] : memref<1x1x128xf32, #tpu.memory_space<vmem>>, vector<1x1x128xf32>
    %202 = vector.shape_cast %201 : vector<1x1x128xf32> to vector<1x128xf32>
    %203 = vector.broadcast %202 : vector<1x128xf32> to vector<8x128xf32>
    %204 = arith.addf %200, %203 : vector<8x128xf32>
    %205 = arith.addf %151, %204 : vector<8x128xf32>
    %c0_87 = arith.constant 0 : index
    %c0_88 = arith.constant 0 : index
    %206 = vector.load %arg18[%c0_87, %c0_88] : memref<8x128xf32, #tpu.memory_space<vmem>>, vector<8x128xf32>
    tpu.vector_store %arg18[%c0_87, %c0_88], %205 {strides = array<i32>} : memref<8x128xf32, #tpu.memory_space<vmem>>, vector<8x128xf32>,
    %c1_i32_89 = arith.constant 1 : i32
    %207 = arith.cmpi eq, %arg1, %c1_i32_89 : i32
    %208 = arith.extui %207 : i1 to i32
    %c0_i32_90 = arith.constant 0 : i32
    %209 = arith.cmpi ne, %208, %c0_i32_90 : i32
    scf.if %209 {
      %c0_91 = arith.constant 0 : index
      %c0_92 = arith.constant 0 : index
      %210 = vector.load %arg16[%c0_91, %c0_92] : memref<1x128xf32, #tpu.memory_space<vmem>>, vector<1x128xf32>
      %c0_93 = arith.constant 0 : index
      %c0_94 = arith.constant 0 : index
      %211 = vector.load %arg17[%c0_93, %c0_94] : memref<1x128xf32, #tpu.memory_space<vmem>>, vector<1x128xf32>
      %cst_95 = arith.constant dense<0.000000e+00> : vector<8xf32>
      %212 = vector.multi_reduction <add>, %205, %cst_95 [1] : vector<8x128xf32> to vector<8xf32>
      %213 = vector.shape_cast %212 : vector<8xf32> to vector<8x1xf32>
      %cst_96 = arith.constant 1.280000e+02 : f32
      %214 = vector.broadcast %cst_96 : f32 to vector<8x1xf32>
      %215 = arith.divf %213, %214 : vector<8x1xf32>
      %216 = vector.broadcast %215 : vector<8x1xf32> to vector<8x128xf32>
      %217 = arith.subf %205, %216 : vector<8x128xf32>
      %218 = arith.mulf %217, %217 : vector<8x128xf32>
      %cst_97 = arith.constant dense<0.000000e+00> : vector<8xf32>
      %219 = vector.multi_reduction <add>, %218, %cst_97 [1] : vector<8x128xf32> to vector<8xf32>
      %220 = vector.shape_cast %219 : vector<8xf32> to vector<8x1xf32>
      %cst_98 = arith.constant 1.280000e+02 : f32
      %221 = vector.broadcast %cst_98 : f32 to vector<8x1xf32>
      %222 = arith.divf %220, %221 : vector<8x1xf32>
      %cst_99 = arith.constant 9.99999974E-6 : f32
      %223 = vector.broadcast %cst_99 : f32 to vector<8x1xf32>
      %224 = arith.addf %222, %223 : vector<8x1xf32>
      %225 = math.rsqrt %224 : vector<8x1xf32>
      %226 = vector.broadcast %225 : vector<8x1xf32> to vector<8x128xf32>
      %227 = arith.mulf %217, %226 : vector<8x128xf32>
      %228 = vector.broadcast %210 : vector<1x128xf32> to vector<8x128xf32>
      %229 = arith.mulf %227, %228 : vector<8x128xf32>
      %230 = vector.broadcast %211 : vector<1x128xf32> to vector<8x128xf32>
      %231 = arith.addf %229, %230 : vector<8x128xf32>
      %c0_100 = arith.constant 0 : index
      %c0_101 = arith.constant 0 : index
      %232 = vector.load %arg18[%c0_100, %c0_101] : memref<8x128xf32, #tpu.memory_space<vmem>>, vector<8x128xf32>
      tpu.vector_store %arg18[%c0_100, %c0_101], %231 {strides = array<i32>} : memref<8x128xf32, #tpu.memory_space<vmem>>, vector<8x128xf32>,
    } else {
    }
    return
  }
  func.func @transform_0(%arg0: i32, %arg1: i32) -> (i32, i32) {
    %c0_i32 = arith.constant 0 : i32
    %c0_i32_0 = arith.constant 0 : i32
    return %arg0, %c0_i32 : i32, i32
  }
  func.func @transform_1(%arg0: i32, %arg1: i32) -> (i32, i32) {
    %c0_i32 = arith.constant 0 : i32
    %c0_i32_0 = arith.constant 0 : i32
    %c0_i32_1 = arith.constant 0 : i32
    return %c0_i32, %c0_i32_0 : i32, i32
  }
  func.func @transform_2(%arg0: i32, %arg1: i32) -> (i32, i32, i32) {
    %c0_i32 = arith.constant 0 : i32
    %c0_i32_0 = arith.constant 0 : i32
    %c0_i32_1 = arith.constant 0 : i32
    return %arg1, %c0_i32, %c0_i32_0 : i32, i32, i32
  }
  func.func @transform_3(%arg0: i32, %arg1: i32) -> (i32, i32, i32) {
    %c0_i32 = arith.constant 0 : i32
    %c0_i32_0 = arith.constant 0 : i32
    %c0_i32_1 = arith.constant 0 : i32
    return %arg1, %c0_i32, %c0_i32_0 : i32, i32, i32
  }
  func.func @transform_4(%arg0: i32, %arg1: i32) -> (i32, i32, i32) {
    %c0_i32 = arith.constant 0 : i32
    %c0_i32_0 = arith.constant 0 : i32
    %c0_i32_1 = arith.constant 0 : i32
    return %arg1, %c0_i32, %c0_i32_0 : i32, i32, i32
  }
  func.func @transform_5(%arg0: i32, %arg1: i32) -> (i32, i32, i32) {
    %c0_i32 = arith.constant 0 : i32
    %c0_i32_0 = arith.constant 0 : i32
    %c0_i32_1 = arith.constant 0 : i32
    return %arg1, %c0_i32, %c0_i32_0 : i32, i32, i32
  }
  func.func @transform_6(%arg0: i32, %arg1: i32) -> (i32, i32, i32) {
    %c0_i32 = arith.constant 0 : i32
    %c0_i32_0 = arith.constant 0 : i32
    %c0_i32_1 = arith.constant 0 : i32
    return %arg1, %c0_i32, %c0_i32_0 : i32, i32, i32
  }
  func.func @transform_7(%arg0: i32, %arg1: i32) -> (i32, i32, i32) {
    %c0_i32 = arith.constant 0 : i32
    %c0_i32_0 = arith.constant 0 : i32
    %c0_i32_1 = arith.constant 0 : i32
    return %arg1, %c0_i32, %c0_i32_0 : i32, i32, i32
  }
  func.func @transform_8(%arg0: i32, %arg1: i32) -> (i32, i32, i32) {
    %c0_i32 = arith.constant 0 : i32
    %c0_i32_0 = arith.constant 0 : i32
    %c0_i32_1 = arith.constant 0 : i32
    return %arg1, %c0_i32, %c0_i32_0 : i32, i32, i32
  }
  func.func @transform_9(%arg0: i32, %arg1: i32) -> (i32, i32, i32) {
    %c0_i32 = arith.constant 0 : i32
    %c0_i32_0 = arith.constant 0 : i32
    %c0_i32_1 = arith.constant 0 : i32
    return %arg1, %c0_i32, %c0_i32_0 : i32, i32, i32
  }
  func.func @transform_10(%arg0: i32, %arg1: i32) -> (i32, i32, i32) {
    %c0_i32 = arith.constant 0 : i32
    %c0_i32_0 = arith.constant 0 : i32
    %c0_i32_1 = arith.constant 0 : i32
    return %arg1, %c0_i32, %c0_i32_0 : i32, i32, i32
  }
  func.func @transform_11(%arg0: i32, %arg1: i32) -> (i32, i32, i32) {
    %c0_i32 = arith.constant 0 : i32
    %c0_i32_0 = arith.constant 0 : i32
    %c0_i32_1 = arith.constant 0 : i32
    return %arg1, %c0_i32, %c0_i32_0 : i32, i32, i32
  }
  func.func @transform_12(%arg0: i32, %arg1: i32) -> (i32, i32, i32) {
    %c0_i32 = arith.constant 0 : i32
    %c0_i32_0 = arith.constant 0 : i32
    %c0_i32_1 = arith.constant 0 : i32
    return %arg1, %c0_i32, %c0_i32_0 : i32, i32, i32
  }
  func.func @transform_13(%arg0: i32, %arg1: i32) -> (i32, i32, i32) {
    %c0_i32 = arith.constant 0 : i32
    %c0_i32_0 = arith.constant 0 : i32
    %c0_i32_1 = arith.constant 0 : i32
    return %arg1, %c0_i32, %c0_i32_0 : i32, i32, i32
  }
  func.func @transform_14(%arg0: i32, %arg1: i32) -> (i32, i32) {
    %c0_i32 = arith.constant 0 : i32
    %c0_i32_0 = arith.constant 0 : i32
    %c0_i32_1 = arith.constant 0 : i32
    return %c0_i32, %c0_i32_0 : i32, i32
  }
  func.func @transform_15(%arg0: i32, %arg1: i32) -> (i32, i32) {
    %c0_i32 = arith.constant 0 : i32
    %c0_i32_0 = arith.constant 0 : i32
    %c0_i32_1 = arith.constant 0 : i32
    return %c0_i32, %c0_i32_0 : i32, i32
  }
  func.func @transform_16(%arg0: i32, %arg1: i32) -> (i32, i32) {
    %c0_i32 = arith.constant 0 : i32
    %c0_i32_0 = arith.constant 0 : i32
    return %arg0, %c0_i32 : i32, i32
  }
}

</mosaic_0001>

<bundles_post_ra>
// kernel: gpt2_artist_forward.1
= control target key start
LH: loop header
LB: loop body
LE: loop exit
PB: predicated region body
PF: predicated region fallthrough
CT: control target
= control target key end

     0   :  { %s4018_s0 = inlined_call_operand.vmem [shape: f32[16,128], index: 0, kind: input, shape index: {}, may-alias: {0,16}]   ;;  %s4019_s1 = inlined_call_operand.vmem [shape: f32[2,8], index: 1, kind: input, shape index: {}]   ;;  %s4020_s2 = inlined_call_operand.vmem [shape: f32[2,1,128], index: 2, kind: input, shape index: {}]   ;;  %s4021_s3 = inlined_call_operand.vmem [shape: f32[2,1,128], index: 3, kind: input, shape index: {}]   ;;  %s4022_s4 = inlined_call_operand.hbm [shape: bf16[2,128,384], index: 4, kind: input, shape index: {}]   ;;  %s4023_s5 = inlined_call_operand.vmem [shape: f32[2,1,384], index: 5, kind: input, shape index: {}]   ;;  %s4024_s6 = inlined_call_operand.vmem [shape: bf16[2,128,128], index: 6, kind: input, shape index: {}]   ;;  %s4025_s7 = inlined_call_operand.vmem [shape: f32[2,1,128], index: 7, kind: input, shape index: {}]   ;;  %s4026_s8 = inlined_call_operand.vmem [shape: f32[2,1,128], index: 8, kind: input, shape index: {}]   ;;  %s4027_s9 = inlined_call_operand.vmem [shape: f32[2,1,128], index: 9, kind: input, shape index: {}]   ;;  %s4028_s10 = inlined_call_operand.hbm [shape: bf16[2,128,512], index: 10, kind: input, shape index: {}]   ;;  %s4029_s11 = inlined_call_operand.vmem [shape: f32[2,1,512], index: 11, kind: input, shape index: {}]   ;;  %s4030_s12 = inlined_call_operand.hbm [shape: bf16[2,512,128], index: 12, kind: input, shape index: {}]   ;;  %s4031_s13 = inlined_call_operand.vmem [shape: f32[2,1,128], index: 13, kind: input, shape index: {}]   ;;  %s4032_s14 = inlined_call_operand.vmem [shape: f32[1,128], index: 14, kind: input, shape index: {}]   ;;  %s4033_s15 = inlined_call_operand.vmem [shape: f32[1,128], index: 15, kind: input, shape index: {}]   ;;  %s4034_s16 = inlined_call_operand.vmem [shape: f32[16,128], index: 16, kind: output, shape index: {}, may-alias: {0,16}]  }
   0x1   :  { %4047 = sst [smem:[#allocation20_spill]] %s4018_s0 }
   0x2   :  { %4048 = sst [smem:[#allocation21_spill]] %s4019_s1 }
   0x3   :  { %4049 = sst [smem:[#allocation22_spill]] %s4022_s4 }
   0x4   :  { %4050 = sst [smem:[#allocation23_spill]] %s4023_s5 }
   0x5   :  { %4051 = sst [smem:[#allocation24_spill]] %s4024_s6 }
   0x6   :  { %4052 = sst [smem:[#allocation25_spill]] %s4025_s7 }
   0x7   :  { %4053 = sst [smem:[#allocation26_spill]] %s4027_s9 }
   0x8   :  { %4054 = sst [smem:[#allocation27_spill]] %s4028_s10 }
   0x9   :  { %4055 = sst [smem:[#allocation28_spill]] %s4029_s11 }
   0xa   :  { %4056 = sst [smem:[#allocation29_spill]] %s4030_s12 }
   0xb   :  { %4057 = sst [smem:[#allocation30_spill]] %s4031_s13 }
   0xc   :  { %4058 = sst [smem:[#allocation31_spill]] %s4032_s14 }
   0xd   :  { %4059 = sst [smem:[#allocation32_spill]] %s4033_s15 }
   0xe   :  { %4060 = sst [smem:[#allocation33_spill]] %s4034_s16 }
   0xf   :  { %21 = vsyncpa [#allocation4], 0 }
  0x10   :  { %23 = vsyncpa [#allocation4 + $0x1], 0 }
  0x11   :  { %24 = vsyncpa [#allocation6], 0 }
  0x12   :  { %26 = vsyncpa [#allocation6 + $0x1], 0  ;;  %s3457_s21 = smov 0   ;;  %s3459_s22 = smov 0  }
  0x13   :  { %s3461_s23 = smov 0   ;;  %s3463_s24 = smov 0  }
  0x14   :  { %s3465_s25 = smov 0   ;;  %s3467_s26 = smov 0  }
  0x15   :  { %s3469_s27 = smov 0   ;;  %s3471_s28 = smov 0  }
  0x16 LB: > { %4061 = sst [smem:[#allocation10_spill]] %s3330_s22  ;;  %s4037_s29 = sadd.s32 4294967295, %s3354_s28   ;;  %s3354_s28 = sphi %s3471_s28, %s32_s28   ;;  %s3350_s27 = sphi %s3469_s27, %s4109_s27   ;;  %s3346_s26 = sphi %s3467_s26, %s4108_s26   ;;  %s3342_s25 = sphi %s3465_s25, %s4107_s25   ;;  %s3338_s24 = sphi %s3463_s24, %s4106_s24   ;;  %s3334_s23 = sphi %s3461_s23, %s4105_s23   ;;  %s3330_s22 = sphi %s3459_s22, %s4104_s22   ;;  %s3326_s21 = sphi %s3457_s21, %s4103_s21  }
  0x17   : > { %4062 = sst [smem:[#allocation11_spill]] %s3334_s23  ;;  %s41_s30 = sadd.s32 1, %s3346_s26 }
  0x18   : > { %4063 = sst [smem:[#allocation12_spill]] %s3342_s25  ;;  %p42_p0 = scmp.ge.s32.totalorder %s41_s30, 2 }
  0x19   : > { %4064 = sst [smem:[#allocation13_spill]] %s3346_s26  ;;  %s44_s0 = sadd.s32 1, %s3350_s27 }
  0x1a   : > { %4065 = sst [smem:[#allocation14_spill]] %s3350_s27  ;;  %s150_s17 = sadd.s32 1, %s3334_s23 }
  0x1b   : > { %4066 = sst [smem:[#allocation15_spill]] %s3354_s28  ;;  %p157_p1 = scmp.ne.s32.totalorder %s3334_s23, %s3330_s22 }
  0x1c   : > { %s4111_s30 = smov (%p42_p0, %s41_s30), 0  ;;  %s4113_s0 = smov (!%p42_p0, %s44_s0), %s3350_s27 }
  0x1d   : > { %4067 = sst [smem:[#allocation16_spill]] %s4111_s30  ;;  %s147_s18 = ssub.s32 %s3346_s26, %s4111_s30 }
  0x1e   : > { %p158_p2 = scmp.eq.s32.totalorder %s3354_s28, 0  ;;  %p46_p3 = scmp.ge.s32.totalorder %s4113_s0, 2 }
  0x1f   : > { %p148_p4 = scmp.eq.s32.totalorder %s147_s18, 0  ;;  %p163_p6 = scmp.ne.s32.totalorder %s3330_s22, %s3326_s21 }
  0x20   : > { %p159_p5 = por %p158_p2, %p157_p1  ;;  %s4115_s0 = smov (%p46_p3, %s4113_s0), 0 }
  0x21   : > { %4068 = sst [smem:[#allocation17_spill]] %s4115_s0  ;;  %p164_p7 = scmp.eq.s32.totalorder %s4037_s29, 0 }
  0x22   : > { %s3511_s19 = scalar_select %p148_p4, %s3334_s23, %s150_s17  }
  0x23   : > { %p2966_p8 = scmp.lt.s32.totalorder %s3354_s28, 4  ;;  %s3517_s20 = sand.u32 1, %s3334_s23  }
  0x24   : > { %4069 = sst [smem:[#allocation18_spill]] %s3511_s19  ;;  %p3519_p9 = por %p164_p7, %p163_p6 }
  0x25   : > { %s571_s30 = sand.u32 1, %s3354_s28   ;;  %p3524_p10 = pnand %p2966_p8, %p159_p5 }
  0x26   : > { %s4070_s27 = scalar_select %p3519_p9, 1, 0 }
  0x27   : > { %s4039_s21 = sshll.u32 %s3517_s20, 8  ;;  %s4040_s17 = sshll.u32 %s3346_s26, 12 }
  0x28   : > { %s4072_s10 = sld [smem:[#allocation27_spill]]  ;;  %s575_s23 = scalar_lea.vmem [#allocation5], %s4039_s21 }
  0x29   : > { %s582_s15 = sshll.u32 %s575_s23, 4  ;;  %s3541_s14 = scalar_lea.sflag [#allocation6], %s571_s30  ;;  %s3539_s15 = int_to_ptr.vmem [resolvable:$true] %s582_s15 }
  0x2a   : > { %p3547_p12 = pneg %p3524_p10 }
  0x2e   : > { %s3535_s19 = scalar_lea.hbm %s4072_s10, %s4040_s17  ;;  %s3199_s21 = scalar_lea.hbm %s4072_s10, 8192 }
  0x2f   : > { %s3194_s1 = scalar_lea.hbm %s3535_s19, 4096  ;;  %p3200_p1 = scmp.lt.u32.totalorder %s3535_s19, %s4072_s10 }
  0x30   : > { %p3195_p11 = scmp.ne.s32.totalorder %s3535_s19, %s3194_s1  ;;  %p3201_p2 = scmp.lt.u32.totalorder %s3199_s21, %s3194_s1 }
  0x31   : > { %p3203_p4 = scmp.lt.u32.totalorder %s3194_s1, %s3535_s19 }
  0x32   : > { %p3197_p13 = pnand %p3547_p12, %p3195_p11  ;;  %p3202_p3 = por %p3201_p2, %p3200_p1 }
  0x34   : > { %p3198_p0 = pneg %p3197_p13  ;;  %p3204_p5 = por %p3203_p4, %p3202_p3 }
  0x36   : > { %p3205_p6 = pnand %p3204_p5, %p3198_p0 }
  0x38   : > { %3208 = shalt.err (!%p3205_p6)
}
  0x39   : > { %s3209_s30 = scalar_lea.vmem %s3539_s15, 4096  ;;  %s3356_s29 = smov [#allocation5]  }
  0x3a   : > { %p3210_p7 = scmp.ne.s32.totalorder %s3539_s15, %s3209_s30  ;;  %s3214_s0 = sshll.u32 %s3356_s29, 4  ;;  %s3215_s0 = int_to_ptr.vmem [resolvable:$false] %s3214_s0 }
  0x3b   : > { %s3216_s17 = scalar_lea.vmem %s3215_s0, 8192  ;;  %p3217_p13 = scmp.lt.s32.totalorder %s3539_s15, %s3215_s0 }
  0x3c   : > { %p3212_p8 = pnand %p3210_p7, %p3547_p12  ;;  %p3218_p9 = scmp.lt.s32.totalorder %s3216_s17, %s3209_s30 }
  0x3e   : > { %p3213_p11 = pneg %p3212_p8  ;;  %p3219_p1 = por %p3218_p9, %p3217_p13 }
  0x40   : > { %p3220_p2 = pnand %p3219_p1, %p3213_p11 }
  0x42   : > { %3223 = shalt.err (!%p3220_p2)
}
  0x43   : > { %s3357_s1 = smov 256   ;;  %s3358_s21 = smov 16  }
  0x44   : > { %2962 = dma.hbm_to_vmem [thread:$0]  (!%p3524_p10), %s3535_s19, 4096, %s3539_s15, %s3541_s14, %s3357_s1, %s3357_s1, %s3358_s21  }
  0x45   : > { %s4074_s23 = sshll.u32 %s3346_s26, 12  ;;  %s4075_s12 = sld [smem:[#allocation29_spill]] }
  0x46   : > { %s4076_s17 = sshll.u32 %s3517_s20, 8  ;;  %p2653_p9 = scmp.ge.s32.totalorder %s3354_s28, 1 }
  0x47   : > { %s603_s10 = scalar_lea.vmem [#allocation7], %s4076_s17  ;;  %p624_p0 = scmp.lt.s32.totalorder %s3354_s28, 5 }
  0x48   : > { %s610_s11 = sshll.u32 %s603_s10, 4  ;;  %s2946_s9 = smul.u32 192, %s3517_s20  ;;  %s3580_s11 = int_to_ptr.vmem [resolvable:$true] %s610_s11 }
  0x49   : > { %p3584_p3 = pnand %p2653_p9, %p624_p0  ;;  %s2947_s15 = smul.u32 3072, %s3346_s26 }
  0x4a   : > { %s4078_s4 = sld [smem:[#allocation22_spill]]  ;;  %s521_s10 = scalar_lea.vmem [#allocation3], %s2946_s9 }
  0x4b   : > { %s3576_s0 = scalar_lea.hbm %s4075_s12, %s4074_s23  ;;  %s528_s23 = sshll.u32 %s521_s10, 4  ;;  %s3595_s23 = int_to_ptr.vmem [resolvable:$true] %s528_s23 }
  0x4c   : > { %s4077_s13 = scalar_select %p3584_p3, 1, 0 }
  0x4d   : > { %s518_s30 = scalar_lea.sflag [#allocation4], %s3517_s20 }
  0x50   : > { %s3593_s21 = scalar_lea.hbm %s4078_s4, %s2947_s15  ;;  %s3229_s19 = scalar_lea.hbm %s4078_s4, 6144 }
  0x51   : > { %s3224_s29 = scalar_lea.hbm %s3593_s21, 3072  ;;  %p3230_p7 = scmp.lt.u32.totalorder %s3593_s21, %s4078_s4 }
  0x52   : > { %p3225_p4 = scmp.ne.s32.totalorder %s3593_s21, %s3224_s29  ;;  %p3231_p8 = scmp.lt.u32.totalorder %s3229_s19, %s3224_s29 }
  0x53   : > { %p3233_p13 = scmp.lt.u32.totalorder %s3224_s29, %s3593_s21 }
  0x54   : > { %p3227_p5 = pnand %p3225_p4, %p3547_p12  ;;  %p3232_p11 = por %p3231_p8, %p3230_p7 }
  0x56   : > { %p3228_p6 = pneg %p3227_p5  ;;  %p3234_p1 = por %p3233_p13, %p3232_p11 }
  0x58   : > { %p3235_p2 = pnand %p3234_p1, %p3228_p6 }
  0x5a   : > { %3238 = shalt.err (!%p3235_p2)
}
  0x5b   : > { %s3239_s9 = scalar_lea.vmem %s3595_s23, 3072  ;;  %s3359_s26 = smov [#allocation3]  }
  0x5c   : > { %p3240_p9 = scmp.ne.s32.totalorder %s3595_s23, %s3239_s9  ;;  %s3244_s10 = sshll.u32 %s3359_s26, 4  ;;  %s3245_s10 = int_to_ptr.vmem [resolvable:$false] %s3244_s10 }
  0x5d   : > { %s3246_s17 = scalar_lea.vmem %s3245_s10, 6144  ;;  %p3247_p5 = scmp.lt.s32.totalorder %s3595_s23, %s3245_s10 }
  0x5e   : > { %p3242_p0 = pnand %p3240_p9, %p3547_p12  ;;  %p3248_p3 = scmp.lt.s32.totalorder %s3246_s17, %s3239_s9 }
  0x60   : > { %p3243_p4 = pneg %p3242_p0  ;;  %p3249_p7 = por %p3248_p3, %p3247_p5 }
  0x62   : > { %p3250_p8 = pnand %p3249_p7, %p3243_p4 }
  0x64   : > { %3253 = shalt.err (!%p3250_p8)
}
  0x65   : > { %s3360_s29 = smov 192   ;;  %s3361_s19 = smov 12  }
  0x66   : > { %2959 = dma.hbm_to_vmem [thread:$0]  (!%p3524_p10), %s3593_s21, 3072, %s3595_s23, %s518_s30, %s3360_s29, %s3360_s29, %s3361_s19  }
  0x67   : > { %s3254_s15 = scalar_lea.hbm %s3576_s0, 4096  ;;  %s3259_s26 = scalar_lea.hbm %s4075_s12, 8192 }
  0x68   : > { %p3255_p6 = scmp.ne.s32.totalorder %s3576_s0, %s3254_s15  ;;  %p3260_p13 = scmp.lt.u32.totalorder %s3576_s0, %s4075_s12 }
  0x69   : > { %p3261_p1 = scmp.lt.u32.totalorder %s3259_s26, %s3254_s15  ;;  %p3263_p9 = scmp.lt.u32.totalorder %s3254_s15, %s3576_s0 }
  0x6a   : > { %p3257_p3 = pnand %p3255_p6, %p3547_p12 }
  0x6b   : > { %p3262_p2 = por %p3261_p1, %p3260_p13 }
  0x6c   : > { %p3258_p11 = pneg %p3257_p3 }
  0x6d   : > { %p3264_p0 = por %p3263_p9, %p3262_p2 }
  0x6f   : > { %p3265_p4 = pnand %p3264_p0, %p3258_p11 }
  0x71   : > { %3268 = shalt.err (!%p3265_p4)
}
  0x72   : > { %s3269_s20 = scalar_lea.vmem %s3580_s11, 4096  ;;  %s3362_s21 = smov [#allocation7]  }
  0x73   : > { %p3270_p5 = scmp.ne.s32.totalorder %s3580_s11, %s3269_s20  ;;  %s3274_s23 = sshll.u32 %s3362_s21, 4  ;;  %s3275_s23 = int_to_ptr.vmem [resolvable:$false] %s3274_s23 }
  0x74   : > { %s3276_s30 = scalar_lea.vmem %s3275_s23, 8192  ;;  %p3277_p6 = scmp.lt.s32.totalorder %s3580_s11, %s3275_s23 }
  0x75   : > { %p3272_p7 = pnand %p3270_p5, %p3547_p12  ;;  %p3278_p3 = scmp.lt.s32.totalorder %s3276_s30, %s3269_s20 }
  0x77   : > { %p3273_p8 = pneg %p3272_p7  ;;  %p3279_p13 = por %p3278_p3, %p3277_p6 }
  0x79   : > { %p3280_p1 = pnand %p3279_p13, %p3273_p8 }
  0x7b   : > { %3283 = shalt.err (!%p3280_p1)
}
  0x7c   : > { %s3363_s29 = smov 64   ;;  %s3364_s19 = smov 4  }
  0x7d   : > { %2965 = dma.hbm_to_vmem [thread:$0]  (!%p3524_p10), %s3576_s0, 4096, %s3580_s11, %s3541_s14, %s3363_s29, %s3363_s29, %s3364_s19  }
  0x7e   : > { %p4079_p12 = scmp.ne.s32.totalorder %s4077_s13, 0 }
  0x80   : > { %628 = sbr.rel (%p4079_p12) target bundleno = 3437 (0xd6d), region = 84 }
  0x87   : > { %s3646_s16 = sand.u32 1, %s3330_s22   ;;  %p4080_p11 = scmp.ne.s32.totalorder %s4070_s27, 0 }
  0x88   : > { %s2948_s15 = smul.u32 192, %s3646_s16  ;;  %s631_s1 = scalar_lea.sflag [#allocation4], %s3646_s16 }
  0x8a   : > { %s3650_s9 = scalar_lea.vmem [#allocation3], %s2948_s15 }
  0x8b   : > { %3317 = dma.done.wait (%p4080_p11), %s631_s1, 3072  }
  0x8c   : > { %3319 = vsyncadd (%p4080_p11), %s631_s1, 4294964224  ;;  %s4081_s11 = sadd.s32 4294967295, %s3354_s28   ;;  %s2654_s14 = sshll.u32 %s3646_s16, 8 }
  0x8d   : > { %s639_s13 = sand.u32 1, %s4081_s11   ;;  %s3659_s0 = scalar_lea.vmem [#allocation5], %s2654_s14 }
  0x8e   : > { %s640_s18 = scalar_lea.sflag [#allocation6], %s639_s13  ;;  %4082 = sst [smem:[#allocation19_spill]] %s3659_s0 }
  0x8f   : > { %3321 = dma.done.wait (%p4080_p11), %s640_s18, 8192  }
  0x90   : > { %3323 = vsyncadd (%p4080_p11), %s640_s18, 4294959104  ;;  %p745_p10 = scmp.lt.s32.totalorder %s3342_s25, 1  ;;  %p749_p2 = scmp.lt.s32.totalorder %s3338_s24, 1 }
  0x91   : > { %s4083_s21 = sld [smem:[#allocation20_spill]]  ;;  %s4085_s5 = sld [smem:[#allocation23_spill]] }
  0x92   : > { %s746_s26 = scalar_select %p745_p10, %s3342_s25, 1 }
  0x93   : > { %s3669_s10 = scalar_select %p749_p2, %s3338_s24, 1 }
  0x94   : > { %s2656_s27 = sshll.u32 %s746_s26, 3  ;;  %s4086_s6 = sld [smem:[#allocation24_spill]] }
  0x95   : > { %s2949_s11 = smul.u32 3, %s3669_s10  ;;  %s2779_s13 = sshll.u32 %s3669_s10, 6 }
  0x96   : > { %s769_s16 = scalar_lea.vmem %s4026_s8, %s3669_s10  ;;  %s4087_s19 = sld [smem:[#allocation26_spill]] }
  0x97   : > { %s748_s23 = scalar_lea.vmem %s4083_s21, %s2656_s27  ;;  %s3691_s28 = scalar_lea.vmem %s4085_s5, %s2949_s11 }
  0x98   : > { %s2659_s4 = sshll.u32 %s3669_s10, 2  ;;  %s4088_s7 = sld [smem:[#allocation30_spill]] }
  0x99   : > { %s4089_s5 = sld [smem:[#allocation28_spill]]  ;;  %s4090_s20 = sld [smem:[#allocation33_spill]] }
  0x9a   : > { %s3696_s21 = scalar_lea.vmem %s4086_s6, %s2779_s13  ;;  %s3721_s30 = scalar_lea.vmem [#allocation7], %s2654_s14 }
  0x9b   : > { %p2661_p9 = scmp.ne.s32.totalorder %s3338_s24, 0 }
  0x9c   : > { %s772_s0 = scalar_lea.vmem %s4087_s19, %s3669_s10  ;;  %v789_v0 = vld [vmem:[%s748_s23] sm:$0xff] (!%p2661_p9) }
  0x9d   : > { %788 = sbr.rel (%p2661_p9) target bundleno = 164 (0xa4), region = 100 }
  0x9e   : > { %s779_s22 = scalar_lea.vmem %s4088_s7, %s3669_s10 }
  0x9f   : > { %s3714_s25 = scalar_lea.vmem %s4089_s5, %s2659_s4  ;;  %s3719_s6 = scalar_lea.vmem %s4090_s20, %s2656_s27 }
  0xa0   : > { %790 = vst [vmem:[%s3719_s6] sm:$0xff] (!%p2661_p9), %v789_v0 }
  0xa4 PF: > { %v3044_v2 = vld [vmem:[%s3650_s9 + $0x4] ss:$12 sps:$4 sm:$0xff]   ;;  %v3046_v3 = vld [vmem:[%s3650_s9] ss:$12 sps:$4 sm:$0xff]   ;;  %v3365_v4 = vmov 0.0   ;;  %v3366_v26 = vmov 0   ;;  %s4091_s12 = scalar_lea.vmem %s4020_s2, %s3669_s10  ;;  %s4092_s27 = scalar_lea.vmem %s4021_s3, %s3669_s10  ;;  %v855_v42 = vlaneseq }
  0xa5   : > { %2858 = vmatprep.subr.bf16.mxu1 %v3365_v4  ;;  %v3047_v5 = vld [vmem:[%s3650_s9 + $0x8] ss:$12 sps:$4 sm:$0xff]   ;;  %v3050_v7 = vld [vmem:[%s3650_s9 + $0x18] ss:$12 sps:$4 sm:$0xff]   ;;  %998 = vmatprep.subr.bf16.mxu0 %v3044_v2  ;;  %v3051_v8 = vld [vmem:[%s3650_s9 + $0x20] ss:$12 sps:$4 sm:$0xff]  }
  0xa6   : > { %v3048_v6 = vld [vmem:[%s3650_s9 + $0x1c] ss:$12 sps:$4 sm:$0xff]   ;;  %v3052_v9 = vld [vmem:[%s3650_s9 + $0x34] ss:$12 sps:$4 sm:$0xff]   ;;  %999 = vmatpush1.bf16.msra.mxu0 %v3046_v3  ;;  %2859 = vmatpush3.bf16.msra.mxu1 %v3047_v5  ;;  %v3055_v15 = vld [vmem:[%s3650_s9 + $0x38] ss:$12 sps:$4 sm:$0xff]  }
  0xa7   : > { %v3726_v1 = vld [vmem:[%s3719_s6] sm:$0xff]  ;;  %1000 = vmatprep.subr.bf16.mxu0 %v3048_v6  ;;  %2860 = vmatprep.subr.bf16.mxu1 %v3365_v4  ;;  %v3058_v17 = vld [vmem:[%s3650_s9 + $0x48] ss:$12 sps:$4 sm:$0xff]   ;;  %v3060_v19 = vld [vmem:[%s3650_s9 + $0x64] ss:$12 sps:$4 sm:$0xff]   ;;  %vm3367_vm0 = vmmov 0  }
  0xa8   : > { %794 = vadd.xlane.f32.xlu0 %v3726_v1  ;;  %v3054_v14 = vld [vmem:[%s3650_s9 + $0x30] ss:$12 sps:$4 sm:$0xff]   ;;  %v3056_v16 = vld [vmem:[%s3650_s9 + $0x4c] ss:$12 sps:$4 sm:$0xff]   ;;  %v3063_v21 = vld [vmem:[%s3650_s9 + $0x68] ss:$12 sps:$4 sm:$0xff]   ;;  %1030 = vmatprep.mubr.bf16.mxu0 %v3366_v26 }
  0xa9   : > { %v3059_v18 = vld [vmem:[%s3650_s9 + $0x50] ss:$12 sps:$4 sm:$0xff]   ;;  %v3062_v20 = vld [vmem:[%s3650_s9 + $0x60] ss:$12 sps:$4 sm:$0xff]   ;;  %v3066_v23 = vld [vmem:[%s3650_s9 + $0x78] ss:$12 sps:$4 sm:$0xff]   ;;  %2874 = vmatprep.mubr.msk.bf16.mxu1 %vm3367_vm0, %v3365_v4 }
  0xaa   : > { %1001 = vmatpush1.bf16.msra.mxu0 %v3050_v7  ;;  %2861 = vmatpush3.bf16.msra.mxu1 %v3051_v8  ;;  %v3064_v22 = vld [vmem:[%s3650_s9 + $0x7c] ss:$12 sps:$4 sm:$0xff]   ;;  %v3067_v24 = vld [vmem:[%s3650_s9 + $0x80] ss:$12 sps:$4 sm:$0xff]   ;;  %v3071_v28 = vld [vmem:[%s3650_s9 + $0x98] ss:$12 sps:$4 sm:$0xff]  }
  0xab   : > { %1002 = vmatprep.subr.bf16.mxu0 %v3052_v9  ;;  %2862 = vmatprep.subr.bf16.mxu1 %v3365_v4  ;;  %v3068_v25 = vld [vmem:[%s3650_s9 + $0x94] ss:$12 sps:$4 sm:$0xff]   ;;  %v3070_v27 = vld [vmem:[%s3650_s9 + $0x90] ss:$12 sps:$4 sm:$0xff]   ;;  %v3072_v29 = vld [vmem:[%s3650_s9 + $0xac] ss:$12 sps:$4 sm:$0xff]  }
  0xac   : > { %v3074_v30 = vld [vmem:[%s3650_s9 + $0xa8] ss:$12 sps:$4 sm:$0xff]   ;;  %v3075_v31 = vld [vmem:[%s3650_s9 + $0xb0] ss:$12 sps:$4 sm:$0xff]   ;;  %v2662_v36 = vld [vmem:[%s4091_s12] ss:$0 sm:$0xff] }
  0xad   : > { %v2663_v38 = vld [vmem:[%s4092_s27] ss:$0 sm:$0xff]  ;;  %v3781_v43 = vshrl.u32 %v855_v42, 7  ;;  %vm1098_vm1 = vcmask 261120   ;;  %s4093_s23 = sld [smem:[#allocation12_spill]]  ;;  %s3369_s19 = smov 32  }
  0xae   : > { %1003 = vmatpush1.bf16.msra.mxu0 %v3054_v14  ;;  %2863 = vmatpush3.bf16.msra.mxu1 %v3055_v15  ;;  %v853_v45 = vld [vmem:[%s3691_s28] sm:$0x7]  ;;  %s3368_s28 = smov 96   ;;  %vm1163_vm2 = vcmask 1043456   ;;  %s4094_s15 = sld [smem:[#allocation21_spill]]  ;;  %v1082_v7 = vand.u32 127, %v855_v42 }
  0xaf   : > { %2864 = vmatprep.subr.bf16.mxu1 %v3365_v4  ;;  %1004 = vmatprep.subr.bf16.mxu0 %v3056_v16  ;;  %v861_v44 = vsub.s32 1, %v3781_v43  ;;  %v865_v46 = vsub.s32 2, %v3781_v43  ;;  %v3789_v48 = vsub.s32 0, %v3781_v43  ;;  %vm1147_vm7 = vcmask 64512   ;;  %s3371_s18 = smov 64   ;;  %s4096_s13 = sld [smem:[#allocation25_spill]] }
  0xb0   : > { %vm1083_vm4 = vcmp.le.s32.totalorder %v1082_v7, %v3781_v43  ;;  %vm1327_vm8 = vcmask 523520   ;;  %vm1445_vm9 = vcmask 785920   ;;  %vm1563_vm10 = vcmask 1048320   ;;  %p2772_p0 = scmp.ne.s32.totalorder %s3338_s24, 1 }
  0xb1   : > { %v862_v47 = vrot.slane %v853_v45, %v861_v44  ;;  %v866_v53 = vrot.slane %v853_v45, %v865_v46  ;;  %v858_v59 = vrot.slane %v853_v45, %v3789_v48  ;;  %s4101_s27 = sld [smem:[#allocation32_spill]] (!%p2772_p0) }
  0xb2   : > { %1005 = vmatpush1.bf16.msra.mxu0 %v3058_v17  ;;  %2865 = vmatpush3.bf16.msra.mxu1 %v3059_v18 }
  0xb3   : > { %2866 = vmatprep.subr.bf16.mxu1 %v3365_v4  ;;  %1006 = vmatprep.subr.bf16.mxu0 %v3060_v19 }
  0xb4   : > { %s1084_s4 = scalar_lea.vmem %s4094_s15, %s4093_s23 }
  0xb5   : > { %v1085_v5 = vld [vmem:[%s1084_s4] sm:$0x1]  ;;  %s4097_s17 = scalar_lea.vmem %s4096_s13, %s3669_s10 }
  0xb6   : > { %1007 = vmatpush1.bf16.msra.mxu0 %v3062_v20  ;;  %2867 = vmatpush3.bf16.msra.mxu1 %v3063_v21  ;;  %vm1086_vm3 = vcmp.gt.f32.partialorder %v1085_v5, 0.5 }
  0xb7   : > { %1008 = vmatprep.subr.bf16.mxu0 %v3064_v22  ;;  %2868 = vmatprep.subr.bf16.mxu1 %v3365_v4  ;;  %v1087_v6 = vsel %vm1086_vm3, 1, %v3366_v26 }
  0xb8   : > { %v1091_v8 = vrot.slane %v1087_v6, %v3789_v48 }
  0xba   : > { %1009 = vmatpush1.bf16.msra.mxu0 %v3066_v23  ;;  %2869 = vmatpush3.bf16.msra.mxu1 %v3067_v24  ;;  %vm1092_vm5 = vcmp.eq.s32.totalorder %v1091_v8, 1 }
  0xbb   : > { %1010 = vmatprep.subr.bf16.mxu0 %v3068_v25  ;;  %2870 = vmatprep.subr.bf16.mxu1 %v3365_v4  ;;  %vm1093_vm6 = vmand %vm1083_vm4, %vm1092_vm5 }
  0xbe   : > { %1011 = vmatpush1.bf16.msra.mxu0 %v3070_v27  ;;  %2871 = vmatpush3.bf16.msra.mxu1 %v3071_v28 }
  0xbf   : > { %1012 = vmatprep.subr.bf16.mxu0 %v3072_v29  ;;  %2872 = vmatprep.subr.bf16.mxu1 %v3365_v4 }
  0xc2   : > { %1013 = vmatpush1.bf16.msra.mxu0 %v3074_v30  ;;  %2873 = vmatpush3.bf16.msra.mxu1 %v3075_v31 }
  0xc3   : > { %2878 = vmatprep.subr.bf16.mxu1 %v3365_v4  ;;  %2902 = vmatprep.subr.bf16.mxu0 %v3365_v4 }
 0x135   : > { %v795_v10 = vpop.xlane.xlu0 %794 }
 0x136   : > { %v797_v11 = vmul.f32 0.0078125, %v795_v10  ;;  %v3370_v10 = vmov -3.4028235e+38  }
 0x138   : > { %v798_v12 = vsub.f32 %v3726_v1, %v797_v11  ;;  %v3813_v11 = vsel %vm1093_vm6, 0.0, %v3370_v10 }
 0x13a   : > { %v799_v13 = vmul.f32 %v798_v12, %v798_v12 }
 0x13c   : > { %800 = vadd.xlane.f32.xlu0 %v799_v13 }
 0x1c9   : > { %v801_v32 = vpop.xlane.xlu0 %800 }
 0x1ca   : > { %v802_v33 = vmul.f32 0.0078125, %v801_v32 }
 0x1cc   : > { %v803_v34 = vadd.f32 1e-05, %v802_v33 }
 0x1ce   : > { %3164 = vrsqrt.f32 %v803_v34 }
 0x1d8   : > { %v3165_v35 = vpop.eup %3164 }
 0x1d9   : > { %v805_v37 = vmul.f32 %v3165_v35, %v798_v12 }
 0x1db   : > { %v812_v39 = vmul.f32 %v2662_v36, %v805_v37 }
 0x1dd   : > { %v819_v40 = vadd.f32 %v2663_v38, %v812_v39 }
 0x1df   : > { %v820_v41 = vpack.c.bf16 %v819_v40, %v819_v40 }
 0x1e1   : > { %1031 = vmatmul.mubr.bf16.vlgmr.msra.gmra.mrb[0].mxu0 %v820_v41  ;;  %2875 = vmatmul.mubr.bf16.vlgmr.msra.gmra.mrb[0].mxu1 %v820_v41 }
 0x1e2   : > { %2880 = vmatprep.mubr.msk.bf16.mxu1 %vm3367_vm0, %v3365_v4  ;;  %2904 = vmatprep.mubr.msk.bf16.mxu0 %vm3367_vm0, %v3365_v4 }
 0x2b4   : > { %v1032_v49 = vpop.f32.mrb[0].mxu0  ;;  %v1073_v50 = vpop.f32.mrb[0].mxu1 }
 0x2b5   : > { %v1034_v51 = vpop.f32.mrb[1].mxu0  ;;  %v2876_v52 = vpop.f32.mrb[1].mxu1  ;;  %v1074_v61 = vadd.f32 %v1073_v50, %v866_v53  ;;  %v1033_v63 = vadd.f32 %v1032_v49, %v858_v59 }
 0x2b6   : > { %v1035_v54 = vadd.f32 %v1034_v51, %v862_v47  ;;  %v1036_v55 = vpop.f32.mrb[2].mxu0  ;;  %v1076_v56 = vpop.f32.mrb[2].mxu1 }
 0x2b7   : > { %v1037_v57 = vpop.f32.mrb[3].mxu0  ;;  %v2877_v58 = vpop.f32.mrb[3].mxu1  ;;  %v3797_v0 = vpack.c.bf16 %v1074_v61, %v1074_v61  ;;  %v1095_v2 = vpack.c.bf16 %v1033_v63, %v1033_v63 }
 0x2b8   : > { %v1096_v60 = vpack.c.bf16 %v1035_v54, %v1035_v54 }
 0x2b9   : > { %v1165_v3 = vsel %vm1163_vm2, %v3797_v0, 0 }
 0x2ba   : > { %1212 = vrot.lane.b32.xlu0 %v1096_v60, %s3368_s28  ;;  %v1103_v62 = vsel %vm1098_vm1, %v1096_v60, 0 }
 0x2bb   : > { %2879 = vmatpush3.bf16.xpose.msra.mxu1 %v1103_v62 }
 0x2bc   : > { %2884 = vmatprep.subr.bf16.mxu1 %v3365_v4 }
 0x2be   : > { %1449 = vrot.lane.b32.xlu0 %v1096_v60, %s3369_s19 }
 0x2c2   : > { %2881 = vmatmul.mubr.msk.bf16.vlgmr.msra.gmra.mrb[4].mxu1 %vm1098_vm1, %v1095_v2 }
 0x2c3   : > { %2885 = vmatpush3.bf16.msra.mxu1 %v1165_v3  ;;  %2886 = vmatprep.mubr.msk.bf16.mxu1 %vm3367_vm0, %v3365_v4 }
 0x2c4   : > { %2890 = vmatprep.subr.bf16.mxu1 %v3365_v4 }
 0x32c   : > { %v1213_v25 = vpop.permute.xlu0 %1212 }
 0x32d   : > { %v1218_v33 = vsel %vm1098_vm1, %v1213_v25, 0 }
 0x330   : > { %v1450_v31 = vpop.permute.xlu0 %1449 }
 0x331   : > { %v1455_v35 = vsel %vm1098_vm1, %v1450_v31, 0 }
 0x395   : > { %v1139_v9 = vpop.f32.mrb[4].mxu1 }
 0x396   : > { %v1145_v12 = vmul.f32 0.17677669, %v1139_v9  ;;  %v2882_v13 = vpop.f32.mrb[5].mxu1 }
 0x397   : > { %v1142_v14 = vpop.f32.mrb[6].mxu1 }
 0x398   : > { %v2883_v15 = vpop.f32.mrb[7].mxu1  ;;  %v1146_v16 = vadd.f32 %v1145_v12, %v3813_v11 }
 0x39a   : > { %v1148_v17 = vsel %vm1147_vm7, %v1146_v16, -inf }
 0x39b   : > { %1149 = vmax.xlane.f32.xlu1 %v1148_v17 }
 0x428   : > { %v1150_v18 = vpop.xlane.xlu1 %1149 }
 0x429   : > { %v1151_v19 = vsub.f32 %v1146_v16, %v1150_v18 }
 0x42b   : > { %v1152_v20 = vmul.f32 1.442695, %v1151_v19 }
 0x42d   : > { %3166 = vpow2.f32 %v1152_v20 }
 0x437   : > { %v3167_v21 = vpop.eup %3166 }
 0x438   : > { %v1154_v22 = vsel %vm1147_vm7, %v3167_v21, 0.0 }
 0x439   : > { %1155 = vadd.xlane.f32.xlu1 %v1154_v22 }
 0x44a   : > { %1209 = vrot.lane.b32.xlu1 %v1095_v2, %s3368_s28 }
 0x44e   : > { %1331 = vrot.lane.b32.xlu1 %v1096_v60, %s3371_s18 }
 0x452   : > { %1329 = vrot.lane.b32.xlu1 %v1095_v2, %s3371_s18 }
 0x456   : > { %1447 = vrot.lane.b32.xlu1 %v1095_v2, %s3369_s19 }
 0x4c6   : > { %v1156_v23 = vpop.xlane.xlu1 %1155 }
 0x4c7   : > { %3168 = vrcp.f32 %v1156_v23 }
 0x4ca   : > { %v1210_v24 = vpop.permute.xlu1 %1209 }
 0x4ce   : > { %v1332_v27 = vpop.permute.xlu1 %1331 }
 0x4cf   : > { %v1337_v28 = vsel %vm1098_vm1, %v1332_v27, 0 }
 0x4d0   : > { %2903 = vmatpush3.bf16.xpose.msra.mxu0 %v1337_v28 }
 0x4d1   : > { %v3169_v29 = vpop.eup %3168  ;;  %2914 = vmatprep.subr.bf16.mxu0 %v3365_v4 }
 0x4d2   : > { %v1158_v30 = vmul.f32 %v3169_v29, %v3167_v21  ;;  %v1330_v34 = vpop.permute.xlu1 %1329 }
 0x4d4   : > { %v1159_v32 = vpack.c.bf16 %v1158_v30, %v1158_v30 }
 0x4d6   : > { %2887 = vmatmul.mubr.msk.bf16.vlgmr.msra.gmra.mrb[8].mxu1 %vm1147_vm7, %v1159_v32  ;;  %v1448_v36 = vpop.permute.xlu1 %1447 }
 0x4d7   : > { %2891 = vmatpush3.bf16.xpose.msra.mxu1 %v1218_v33  ;;  %2905 = vmatmul.mubr.msk.bf16.vlgmr.msra.gmra.mrb[4].mxu0 %vm1098_vm1, %v1330_v34 }
 0x4d8   : > { %2915 = vmatpush3.bf16.xpose.msra.mxu0 %v1455_v35  ;;  %2892 = vmatprep.mubr.msk.bf16.mxu1 %vm3367_vm0, %v3365_v4 }
 0x4d9   : > { %2916 = vmatprep.mubr.msk.bf16.mxu0 %vm3367_vm0, %v3365_v4  ;;  %2896 = vmatprep.subr.bf16.mxu1 %v3365_v4 }
 0x4da   : > { %2926 = vmatprep.subr.bf16.mxu0 %v3365_v4 }
 0x4de   : > { %2893 = vmatmul.mubr.msk.bf16.vlgmr.msra.gmra.mrb[12].mxu1 %vm1098_vm1, %v1210_v24 }
 0x4df   : > { %2917 = vmatmul.mubr.msk.bf16.vlgmr.msra.gmra.mrb[8].mxu0 %vm1098_vm1, %v1448_v36  ;;  %2898 = vmatprep.mubr.msk.bf16.mxu1 %vm3367_vm0, %v3365_v4 }
 0x4e0   : > { %2942 = vmatprep.mubr.msk.bf16.mxu0 %vm3367_vm0, %v3365_v4 }
 0x5a9   : > { %v1201_v37 = vpop.f32.mrb[8].mxu1 }
 0x5aa   : > { %1207 = vst.msk [vmem:[#allocation2] sm:$0xff] %vm1098_vm1, %v1201_v37  ;;  %v2888_v38 = vpop.f32.mrb[9].mxu1  ;;  %v1373_v39 = vpop.f32.mrb[4].mxu0 }
 0x5ab   : > { %v1379_v40 = vmul.f32 0.17677669, %v1373_v39  ;;  %v1204_v41 = vpop.f32.mrb[10].mxu1  ;;  %v2906_v42 = vpop.f32.mrb[5].mxu0  ;;  %v3076_v38 = vld [vmem:[%s3696_s21] sm:$0xff]   ;;  %v3077_v39 = vld [vmem:[%s3696_s21 + $0x8] sm:$0xff]  }
 0x5ac   : > { %v2889_v45 = vpop.f32.mrb[11].mxu1  ;;  %v1376_v47 = vpop.f32.mrb[6].mxu0  ;;  %2927 = vmatpush3.bf16.msra.mxu0 %v3076_v38  ;;  %v3079_v41 = vld [vmem:[%s3696_s21 + $0x18] sm:$0xff]   ;;  %v3080_v42 = vld [vmem:[%s3696_s21 + $0x20] sm:$0xff]  }
 0x5ad   : > { %v2907_v49 = vpop.f32.mrb[7].mxu0  ;;  %v1380_v50 = vadd.f32 %v1379_v40, %v3813_v11  ;;  %2928 = vmatprep.subr.bf16.mxu0 %v3365_v4  ;;  %v3078_v40 = vld [vmem:[%s3696_s21 + $0x10] sm:$0xff]   ;;  %v3081_v45 = vld [vmem:[%s3696_s21 + $0x28] sm:$0xff]  }
 0x5af   : > { %v1381_v51 = vsel %vm1147_vm7, %v1380_v50, -inf }
 0x5b0   : > { %1382 = vmax.xlane.f32.xlu1 %v1381_v51  ;;  %2929 = vmatpush3.bf16.msra.mxu0 %v3077_v39 }
 0x5b1   : > { %v1254_v52 = vpop.f32.mrb[12].mxu1  ;;  %2930 = vmatprep.subr.bf16.mxu0 %v3365_v4 }
 0x5b2   : > { %v1260_v53 = vmul.f32 0.17677669, %v1254_v52  ;;  %v2894_v54 = vpop.f32.mrb[13].mxu1  ;;  %v1491_v55 = vpop.f32.mrb[8].mxu0  ;;  %v3082_v52 = vld [vmem:[%s3696_s21 + $0x30] sm:$0xff]  }
 0x5b3   : > { %v1497_v56 = vmul.f32 0.17677669, %v1491_v55  ;;  %v1257_v57 = vpop.f32.mrb[14].mxu1  ;;  %v2918_v58 = vpop.f32.mrb[9].mxu0 }
 0x5b4   : > { %v2895_v59 = vpop.f32.mrb[15].mxu1  ;;  %v1494_v60 = vpop.f32.mrb[10].mxu0  ;;  %v1261_v61 = vadd.f32 %v1260_v53, %v3813_v11  ;;  %2931 = vmatpush3.bf16.msra.mxu0 %v3078_v40  ;;  %v3083_v53 = vld [vmem:[%s3696_s21 + $0x38] sm:$0xff]   ;;  %s4095_s21 = sld [smem:[#allocation19_spill]] }
 0x5b5   : > { %v2919_v62 = vpop.f32.mrb[11].mxu0  ;;  %v1498_v2 = vadd.f32 %v1497_v56, %v3813_v11  ;;  %2932 = vmatprep.subr.bf16.mxu0 %v3365_v4 }
 0x5b6   : > { %v1262_v63 = vsel %vm1147_vm7, %v1261_v61, -inf }
 0x5b7   : > { %1263 = vmax.xlane.f32.xlu0 %v1262_v63  ;;  %v1499_v3 = vsel %vm1147_vm7, %v1498_v2, -inf }
 0x5b8   : > { %2933 = vmatpush3.bf16.msra.mxu0 %v3079_v41 }
 0x5b9   : > { %2934 = vmatprep.subr.bf16.mxu0 %v3365_v4 }
 0x5ba   : > { %v3122_v38 = vld [vmem:[%s4095_s21 + $0xc4] ss:$16 sps:$4 sm:$0xff]   ;;  %v3125_v39 = vld [vmem:[%s4095_s21 + $0xcc] ss:$16 sps:$4 sm:$0xff]   ;;  %v3120_v40 = vld [vmem:[%s4095_s21 + $0xc0] ss:$16 sps:$4 sm:$0xff]  }
 0x5bb   : > { %1500 = vmax.xlane.f32.xlu0 %v1499_v3  ;;  %v3123_v41 = vld [vmem:[%s4095_s21 + $0xc8] ss:$16 sps:$4 sm:$0xff]  }
 0x5bc   : > { %2935 = vmatpush3.bf16.msra.mxu0 %v3080_v42  ;;  %v3128_v42 = vld [vmem:[%s4095_s21 + $0xe4] ss:$16 sps:$4 sm:$0xff]  }
 0x5bd   : > { %2936 = vmatprep.subr.bf16.mxu0 %v3365_v4 }
 0x5c0   : > { %2937 = vmatpush3.bf16.msra.mxu0 %v3081_v45  ;;  %v3131_v45 = vld [vmem:[%s4095_s21 + $0xec] ss:$16 sps:$4 sm:$0xff]  }
 0x5c1   : > { %2938 = vmatprep.subr.bf16.mxu0 %v3365_v4 }
 0x5c4   : > { %2939 = vmatpush3.bf16.msra.mxu0 %v3082_v52 }
 0x5c5   : > { %2940 = vmatprep.subr.bf16.mxu0 %v3365_v4 }
 0x5c8   : > { %2941 = vmatpush3.bf16.msra.mxu0 %v3083_v53 }
 0x63d   : > { %v1383_v5 = vpop.xlane.xlu1 %1382 }
 0x63e   : > { %v1384_v6 = vsub.f32 %v1380_v50, %v1383_v5  ;;  %v2696_v5 = vld [vmem:[%s4097_s17] ss:$0 sm:$0xff] }
 0x640   : > { %v1385_v7 = vmul.f32 1.442695, %v1384_v6 }
 0x642   : > { %3170 = vpow2.f32 %v1385_v7 }
 0x644   : > { %v1264_v8 = vpop.xlane.xlu0 %1263 }
 0x645   : > { %v1265_v9 = vsub.f32 %v1261_v61, %v1264_v8 }
 0x647   : > { %v1266_v10 = vmul.f32 1.442695, %v1265_v9 }
 0x648   : > { %v1501_v12 = vpop.xlane.xlu0 %1500 }
 0x649   : > { %3172 = vpow2.f32 %v1266_v10  ;;  %v1502_v13 = vsub.f32 %v1498_v2, %v1501_v12 }
 0x64b   : > { %v1503_v14 = vmul.f32 1.442695, %v1502_v13  ;;  %v3086_v13 = vld [vmem:[%s4095_s21 + $0x4] ss:$16 sps:$4 sm:$0xff]  }
 0x64c   : > { %v3171_v15 = vpop.eup %3170 }
 0x64d   : > { %3174 = vpow2.f32 %v1503_v14  ;;  %v1387_v16 = vsel %vm1147_vm7, %v3171_v15, 0.0  ;;  %v3087_v14 = vld [vmem:[%s4095_s21 + $0x8] ss:$16 sps:$4 sm:$0xff]  }
 0x64e   : > { %1388 = vadd.xlane.f32.xlu0 %v1387_v16  ;;  %v3092_v16 = vld [vmem:[%s4095_s21 + $0x24] ss:$16 sps:$4 sm:$0xff]  }
 0x653   : > { %v3173_v11 = vpop.eup %3172 }
 0x654   : > { %v1268_v17 = vsel %vm1147_vm7, %v3173_v11, 0.0 }
 0x655   : > { %1269 = vadd.xlane.f32.xlu0 %v1268_v17  ;;  %v3090_v17 = vld [vmem:[%s4095_s21 + $0x20] ss:$16 sps:$4 sm:$0xff]  }
 0x657   : > { %v3175_v18 = vpop.eup %3174 }
 0x658   : > { %v1505_v19 = vsel %vm1147_vm7, %v3175_v18, 0.0 }
 0x659   : > { %1506 = vadd.xlane.f32.xlu1 %v1505_v19  ;;  %v3101_v19 = vld [vmem:[%s4095_s21 + $0x4c] ss:$16 sps:$4 sm:$0xff]  }
 0x66a   : > { %1393 = vrot.lane.b32.xlu1 %v3797_v0, %s3371_s18 }
 0x66b   : > { %1275 = vrot.lane.b32.xlu0 %v3797_v0, %s3368_s28 }
 0x66e   : > { %1511 = vrot.lane.b32.xlu1 %v3797_v0, %s3369_s19 }
 0x6db   : > { %v1389_v20 = vpop.xlane.xlu0 %1388 }
 0x6e2   : > { %v1270_v21 = vpop.xlane.xlu0 %1269 }
 0x6e3   : > { %3176 = vrcp.f32 %v1270_v21  ;;  %v3099_v21 = vld [vmem:[%s4095_s21 + $0x48] ss:$16 sps:$4 sm:$0xff]  }
 0x6e4   : > { %3178 = vrcp.f32 %v1389_v20  ;;  %v3096_v20 = vld [vmem:[%s4095_s21 + $0x40] ss:$16 sps:$4 sm:$0xff]  }
 0x6e6   : > { %v1276_v22 = vpop.permute.xlu0 %1275  ;;  %v1507_v24 = vpop.xlane.xlu1 %1506 }
 0x6e7   : > { %v1281_v23 = vsel %vm1163_vm2, %v1276_v22, 0  ;;  %3180 = vrcp.f32 %v1507_v24 }
 0x6e8   : > { %2897 = vmatpush3.bf16.msra.mxu1 %v1281_v23 }
 0x6e9   : > { %2908 = vmatprep.subr.bf16.mxu1 %v3365_v4 }
 0x6ea   : > { %v1394_v28 = vpop.permute.xlu1 %1393 }
 0x6eb   : > { %v1399_v31 = vsel %vm1163_vm2, %v1394_v28, 0  ;;  %v3107_v28 = vld [vmem:[%s4095_s21 + $0x6c] ss:$16 sps:$4 sm:$0xff]  }
 0x6ed   : > { %v3177_v25 = vpop.eup %3176 }
 0x6ee   : > { %v1272_v27 = vmul.f32 %v3177_v25, %v3173_v11  ;;  %v3179_v30 = vpop.eup %3178  ;;  %v1512_v32 = vpop.permute.xlu1 %1511  ;;  %v3095_v11 = vld [vmem:[%s4095_s21 + $0x2c] ss:$16 sps:$4 sm:$0xff]  }
 0x6ef   : > { %v1391_v0 = vmul.f32 %v3179_v30, %v3171_v15  ;;  %v1517_v35 = vsel %vm1163_vm2, %v1512_v32, 0  ;;  %v3089_v15 = vld [vmem:[%s4095_s21 + $0xc] ss:$16 sps:$4 sm:$0xff]   ;;  %v3105_v30 = vld [vmem:[%s4095_s21 + $0x68] ss:$16 sps:$4 sm:$0xff]  }
 0x6f0   : > { %v1273_v29 = vpack.c.bf16 %v1272_v27, %v1272_v27  ;;  %1962 = vmatprep.subr.bf16.mxu0 %v3089_v15  ;;  %v3104_v27 = vld [vmem:[%s4095_s21 + $0x64] ss:$16 sps:$4 sm:$0xff]   ;;  %v3108_v32 = vld [vmem:[%s4095_s21 + $0x80] ss:$16 sps:$4 sm:$0xff]   ;;  %v3148_v15 = vld [vmem:[%s3721_s30 + $0x60] sm:$0xff]  }
 0x6f1   : > { %v1392_v33 = vpack.c.bf16 %v1391_v0, %v1391_v0  ;;  %v3181_v34 = vpop.eup %3180  ;;  %v3113_v0 = vld [vmem:[%s4095_s21 + $0x8c] ss:$16 sps:$4 sm:$0xff]  }
 0x6f2   : > { %2899 = vmatmul.mubr.msk.bf16.vlgmr.msra.gmra.mrb[16].mxu1 %vm1147_vm7, %v1273_v29  ;;  %v1509_v36 = vmul.f32 %v3181_v34, %v3175_v18  ;;  %v3098_v18 = vld [vmem:[%s4095_s21 + $0x44] ss:$16 sps:$4 sm:$0xff]   ;;  %v3102_v29 = vld [vmem:[%s4095_s21 + $0x60] ss:$16 sps:$4 sm:$0xff]  }
 0x6f3   : > { %2909 = vmatpush3.bf16.msra.mxu1 %v1399_v31  ;;  %2910 = vmatprep.mubr.msk.bf16.mxu1 %vm3367_vm0, %v3365_v4  ;;  %v3110_v31 = vld [vmem:[%s4095_s21 + $0x84] ss:$16 sps:$4 sm:$0xff]  }
 0x6f4   : > { %2920 = vmatprep.subr.bf16.mxu1 %v3365_v4  ;;  %v1510_v37 = vpack.c.bf16 %v1509_v36, %v1509_v36  ;;  %v3116_v34 = vld [vmem:[%s4095_s21 + $0xa4] ss:$16 sps:$4 sm:$0xff]   ;;  %v3114_v36 = vld [vmem:[%s4095_s21 + $0xa0] ss:$16 sps:$4 sm:$0xff]  }
 0x6fa   : > { %2911 = vmatmul.mubr.msk.bf16.vlgmr.msra.gmra.mrb[20].mxu1 %vm1147_vm7, %v1392_v33  ;;  %v3111_v33 = vld [vmem:[%s4095_s21 + $0x88] ss:$16 sps:$4 sm:$0xff]  }
 0x6fb   : > { %2921 = vmatpush3.bf16.msra.mxu1 %v1517_v35  ;;  %2922 = vmatprep.mubr.msk.bf16.mxu1 %vm3367_vm0, %v3365_v4  ;;  %v3119_v35 = vld [vmem:[%s4095_s21 + $0xac] ss:$16 sps:$4 sm:$0xff]  }
 0x6fc   : > { %1921 = vmatprep.subr.bf16.mxu1 %v3086_v13  ;;  %v3146_v13 = vld [vmem:[%s3721_s30 + $0x18] sm:$0xff]  }
 0x702   : > { %2923 = vmatmul.mubr.msk.bf16.vlgmr.msra.gmra.mrb[24].mxu1 %vm1147_vm7, %v1510_v37  ;;  %v3117_v37 = vld [vmem:[%s4095_s21 + $0xa8] ss:$16 sps:$4 sm:$0xff]  }
 0x703   : > { %1953 = vmatprep.mubr.bf16.mxu1 %v3366_v26 }
 0x7c5   : > { %v1317_v47 = vpop.f32.mrb[16].mxu1 }
 0x7c6   : > { %1324 = vrot.lane.b32.xlu1 %v1317_v47, %s3369_s19  ;;  %v2900_v49 = vpop.f32.mrb[17].mxu1  ;;  %v3126_v47 = vld [vmem:[%s4095_s21 + $0xe0] ss:$16 sps:$4 sm:$0xff]  }
 0x7c7   : > { %v1320_v50 = vpop.f32.mrb[18].mxu1  ;;  %v3129_v49 = vld [vmem:[%s4095_s21 + $0xe8] ss:$16 sps:$4 sm:$0xff]  }
 0x7c8   : > { %v2901_v51 = vpop.f32.mrb[19].mxu1 }
 0x7cd   : > { %v1435_v54 = vpop.f32.mrb[20].mxu1 }
 0x7ce   : > { %1442 = vrot.lane.b32.xlu0 %v1435_v54, %s3371_s18  ;;  %v2912_v55 = vpop.f32.mrb[21].mxu1  ;;  %v2705_v54 = vld [vmem:[%s769_s16] ss:$0 sm:$0xff] }
 0x7cf   : > { %v1438_v56 = vpop.f32.mrb[22].mxu1 }
 0x7d0   : > { %v2913_v57 = vpop.f32.mrb[23].mxu1  ;;  %v2706_v56 = vld [vmem:[%s772_s0] ss:$0 sm:$0xff] }
 0x7d5   : > { %v1553_v58 = vpop.f32.mrb[24].mxu1 }
 0x7d6   : > { %1560 = vrot.lane.b32.xlu1 %v1553_v58, %s3368_s28  ;;  %v2924_v59 = vpop.f32.mrb[25].mxu1 }
 0x7d7   : > { %v1556_v60 = vpop.f32.mrb[26].mxu1 }
 0x7d8   : > { %v2925_v61 = vpop.f32.mrb[27].mxu1  ;;  %v3132_v60 = vld [vmem:[%s3721_s30 + $0x40] sm:$0xff]  }
 0x7d9   : > { %v3133_v61 = vld [vmem:[%s3721_s30 + $0xc0] sm:$0xff]  }
 0x838   : > { %v1325_v62 = vpop.permute.xlu1 %1324 }
 0x839   : > { %1328 = vst.msk [vmem:[#allocation2] sm:$0xff] %vm1327_vm8, %v1325_v62  ;;  %v3134_v62 = vld [vmem:[%s3721_s30] sm:$0xff]  }
 0x840   : > { %v1443_v63 = vpop.permute.xlu0 %1442 }
 0x841   : > { %1446 = vst.msk [vmem:[#allocation2] sm:$0xff] %vm1445_vm9, %v1443_v63  ;;  %v3135_v63 = vld [vmem:[%s3721_s30 + $0x80] sm:$0xff]  }
 0x848   : > { %v1561_v4 = vpop.permute.xlu1 %1560 }
 0x849   : > { %1564 = vst.msk [vmem:[#allocation2] sm:$0xff] %vm1563_vm10, %v1561_v4  ;;  %v3136_v4 = vld [vmem:[%s3721_s30 + $0x48] sm:$0xff]  }
 0x850   : > { %v1565_v2 = vld [vmem:[#allocation2] sm:$0xff] }
 0x851   : > { %v1566_v3 = vpack.c.bf16 %v1565_v2, %v1565_v2  ;;  %v3137_v2 = vld [vmem:[%s3721_s30 + $0xc8] sm:$0xff]  }
 0x853   : > { %2943 = vmatmul.mubr.bf16.vlgmr.msra.gmra.mrb[12].mxu0 %v1566_v3  ;;  %v3138_v3 = vld [vmem:[%s3721_s30 + $0x8] sm:$0xff]  }
 0x854   : > { %1994 = vmatprep.mubr.bf16.mxu0 %v3366_v26  ;;  %v3084_v26 = vld [vmem:[%s4095_s21] ss:$16 sps:$4 sm:$0xff]   ;;  %1963 = vmatpush1.bf16.msra.mxu0 %v3087_v14 }
 0x855   : > { %1922 = vmatpush1.bf16.msra.mxu1 %v3084_v26  ;;  %1964 = vmatprep.subr.bf16.mxu0 %v3095_v11  ;;  %v3145_v26 = vld [vmem:[%s3721_s30 + $0xd8] sm:$0xff]   ;;  %v3150_v11 = vld [vmem:[%s3721_s30 + $0x20] sm:$0xff]  }
 0x856   : > { %1923 = vmatprep.subr.bf16.mxu1 %v3092_v16  ;;  %v3147_v14 = vld [vmem:[%s3721_s30 + $0x98] sm:$0xff]   ;;  %v3149_v16 = vld [vmem:[%s3721_s30 + $0xe0] sm:$0xff]  }
 0x859   : > { %1924 = vmatpush1.bf16.msra.mxu1 %v3090_v17  ;;  %v3151_v17 = vld [vmem:[%s3721_s30 + $0xa0] sm:$0xff]  }
 0x85a   : > { %1925 = vmatprep.subr.bf16.mxu1 %v3098_v18  ;;  %v3153_v18 = vld [vmem:[%s3721_s30 + $0xe8] sm:$0xff]  }
 0x85d   : > { %1926 = vmatpush1.bf16.msra.mxu1 %v3096_v20  ;;  %v3155_v20 = vld [vmem:[%s3721_s30 + $0xa8] sm:$0xff]  }
 0x85e   : > { %1927 = vmatprep.subr.bf16.mxu1 %v3104_v27  ;;  %v3161_v27 = vld [vmem:[%s3721_s30 + $0xf8] sm:$0xff]  }
 0x861   : > { %1928 = vmatpush1.bf16.msra.mxu1 %v3102_v29  ;;  %v3163_v29 = vld [vmem:[%s3721_s30 + $0xb8] sm:$0xff]  }
 0x862   : > { %1929 = vmatprep.subr.bf16.mxu1 %v3110_v31  ;;  %v1755_v31 = vsub.s32 3, %v3781_v43 }
 0x865   : > { %1930 = vmatpush1.bf16.msra.mxu1 %v3108_v32 }
 0x866   : > { %1931 = vmatprep.subr.bf16.mxu1 %v3116_v34 }
 0x869   : > { %1932 = vmatpush1.bf16.msra.mxu1 %v3114_v36 }
 0x86a   : > { %1933 = vmatprep.subr.bf16.mxu1 %v3122_v38 }
 0x86d   : > { %1934 = vmatpush1.bf16.msra.mxu1 %v3120_v40 }
 0x86e   : > { %1935 = vmatprep.subr.bf16.mxu1 %v3128_v42 }
 0x871   : > { %1936 = vmatpush1.bf16.msra.mxu1 %v3126_v47 }
 0x872   : > { %2814 = vmatprep.subr.bf16.mxu1 %v3132_v60 }
 0x926   : > { %v1672_v6 = vpop.f32.mrb[12].mxu0 }
 0x927   : > { %v1673_v7 = vadd.f32 %v2696_v5, %v1672_v6  ;;  %v2944_v8 = vpop.f32.mrb[13].mxu0  ;;  %v3139_v5 = vld [vmem:[%s3721_s30 + $0x88] sm:$0xff]   ;;  %v3140_v6 = vld [vmem:[%s3721_s30 + $0x50] sm:$0xff]  }
 0x928   : > { %v1675_v9 = vpop.f32.mrb[14].mxu0  ;;  %v3142_v8 = vld [vmem:[%s3721_s30 + $0x10] sm:$0xff]  }
 0x929   : > { %v3894_v10 = vadd.f32 %v1673_v7, %v3726_v1  ;;  %v2945_v12 = vpop.f32.mrb[15].mxu0  ;;  %v3093_v1 = vld [vmem:[%s4095_s21 + $0x28] ss:$16 sps:$4 sm:$0xff]  }
 0x92a   : > { %1965 = vmatpush1.bf16.msra.mxu0 %v3093_v1  ;;  %v3141_v7 = vld [vmem:[%s3721_s30 + $0xd0] sm:$0xff]   ;;  %v3144_v12 = vld [vmem:[%s3721_s30 + $0x58] sm:$0xff]   ;;  %v3152_v1 = vld [vmem:[%s3721_s30 + $0x68] sm:$0xff]  }
 0x92b   : > { %1681 = vadd.xlane.f32.xlu0 %v3894_v10  ;;  %1966 = vmatprep.subr.bf16.mxu0 %v3101_v19  ;;  %v3143_v9 = vld [vmem:[%s3721_s30 + $0x90] sm:$0xff]   ;;  %v3154_v19 = vld [vmem:[%s3721_s30 + $0x28] sm:$0xff]  }
 0x92e   : > { %1967 = vmatpush1.bf16.msra.mxu0 %v3099_v21  ;;  %v3156_v21 = vld [vmem:[%s3721_s30 + $0x70] sm:$0xff]  }
 0x92f   : > { %1968 = vmatprep.subr.bf16.mxu0 %v3107_v28  ;;  %v3162_v28 = vld [vmem:[%s3721_s30 + $0x38] sm:$0xff]  }
 0x932   : > { %1969 = vmatpush1.bf16.msra.mxu0 %v3105_v30  ;;  %v1739_v30 = vld [vmem:[%s3714_s25] sm:$0xf] }
 0x933   : > { %1970 = vmatprep.subr.bf16.mxu0 %v3113_v0  ;;  %v1744_v0 = vrot.slane %v1739_v30, %v3789_v48  ;;  %v1752_v32 = vrot.slane %v1739_v30, %v865_v46  ;;  %v1756_v34 = vrot.slane %v1739_v30, %v1755_v31 }
 0x936   : > { %1971 = vmatpush1.bf16.msra.mxu0 %v3111_v33  ;;  %v1748_v33 = vrot.slane %v1739_v30, %v861_v44 }
 0x937   : > { %1972 = vmatprep.subr.bf16.mxu0 %v3119_v35 }
 0x93a   : > { %1973 = vmatpush1.bf16.msra.mxu0 %v3117_v37 }
 0x93b   : > { %1974 = vmatprep.subr.bf16.mxu0 %v3125_v39 }
 0x93e   : > { %1975 = vmatpush1.bf16.msra.mxu0 %v3123_v41 }
 0x93f   : > { %1976 = vmatprep.subr.bf16.mxu0 %v3131_v45 }
 0x942   : > { %1977 = vmatpush1.bf16.msra.mxu0 %v3129_v49 }
 0x943   : > { %2836 = vmatprep.subr.bf16.mxu0 %v3133_v61 }
 0x9b8   : > { %v1682_v22 = vpop.xlane.xlu0 %1681 }
 0x9b9   : > { %v1683_v23 = vmul.f32 0.0078125, %v1682_v22  ;;  %v3157_v22 = vld [vmem:[%s3721_s30 + $0xf0] sm:$0xff]  }
 0x9bb   : > { %v1684_v24 = vsub.f32 %v3894_v10, %v1683_v23  ;;  %v3158_v23 = vld [vmem:[%s3721_s30 + $0x30] sm:$0xff]  }
 0x9bd   : > { %v1685_v25 = vmul.f32 %v1684_v24, %v1684_v24 }
 0x9bf   : > { %1686 = vadd.xlane.f32.xlu1 %v1685_v25  ;;  %v3160_v25 = vld [vmem:[%s3721_s30 + $0x78] sm:$0xff]  }
 0xa4c   : > { %v1687_v50 = vpop.xlane.xlu1 %1686 }
 0xa4d   : > { %v1688_v51 = vmul.f32 0.0078125, %v1687_v50 }
 0xa4f   : > { %v1689_v52 = vadd.f32 1e-05, %v1688_v51 }
 0xa51   : > { %3182 = vrsqrt.f32 %v1689_v52 }
 0xa5b   : > { %v3183_v53 = vpop.eup %3182 }
 0xa5c   : > { %v1691_v55 = vmul.f32 %v3183_v53, %v1684_v24  ;;  %v3159_v24 = vld [vmem:[%s3721_s30 + $0xb0] sm:$0xff]   ;;  %s4100_s30 = sld [smem:[#allocation31_spill]] (!%p2772_p0) }
 0xa5e   : > { %v1698_v57 = vmul.f32 %v2705_v54, %v1691_v55 }
 0xa60   : > { %v1705_v58 = vadd.f32 %v2706_v56, %v1698_v57 }
 0xa62   : > { %v1706_v59 = vpack.c.bf16 %v1705_v58, %v1705_v58 }
 0xa64   : > { %1954 = vmatmul.mubr.bf16.vlgmr.msra.gmra.mrb[28].mxu1 %v1706_v59  ;;  %1995 = vmatmul.mubr.bf16.vlgmr.msra.gmra.mrb[16].mxu0 %v1706_v59 }
 0xa65   : > { %2815 = vmatpush3.bf16.msra.mxu1 %v3134_v62  ;;  %2837 = vmatpush3.bf16.msra.mxu0 %v3135_v63 }
 0xa66   : > { %2816 = vmatprep.subr.bf16.mxu1 %v3136_v4  ;;  %2838 = vmatprep.subr.bf16.mxu0 %v3137_v2 }
 0xa69   : > { %2817 = vmatpush3.bf16.msra.mxu1 %v3138_v3  ;;  %2839 = vmatpush3.bf16.msra.mxu0 %v3139_v5 }
 0xa6a   : > { %2818 = vmatprep.subr.bf16.mxu1 %v3140_v6  ;;  %2840 = vmatprep.subr.bf16.mxu0 %v3141_v7 }
 0xa6d   : > { %2819 = vmatpush3.bf16.msra.mxu1 %v3142_v8  ;;  %2841 = vmatpush3.bf16.msra.mxu0 %v3143_v9 }
 0xa6e   : > { %2820 = vmatprep.subr.bf16.mxu1 %v3144_v12  ;;  %2842 = vmatprep.subr.bf16.mxu0 %v3145_v26 }
 0xa71   : > { %2821 = vmatpush3.bf16.msra.mxu1 %v3146_v13  ;;  %2843 = vmatpush3.bf16.msra.mxu0 %v3147_v14 }
 0xa72   : > { %2822 = vmatprep.subr.bf16.mxu1 %v3148_v15  ;;  %2844 = vmatprep.subr.bf16.mxu0 %v3149_v16 }
 0xa75   : > { %2823 = vmatpush3.bf16.msra.mxu1 %v3150_v11  ;;  %2845 = vmatpush3.bf16.msra.mxu0 %v3151_v17 }
 0xa76   : > { %2824 = vmatprep.subr.bf16.mxu1 %v3152_v1  ;;  %2846 = vmatprep.subr.bf16.mxu0 %v3153_v18 }
 0xa79   : > { %2825 = vmatpush3.bf16.msra.mxu1 %v3154_v19  ;;  %2847 = vmatpush3.bf16.msra.mxu0 %v3155_v20 }
 0xa7a   : > { %2826 = vmatprep.subr.bf16.mxu1 %v3156_v21  ;;  %2848 = vmatprep.subr.bf16.mxu0 %v3157_v22 }
 0xa7d   : > { %2827 = vmatpush3.bf16.msra.mxu1 %v3158_v23  ;;  %2849 = vmatpush3.bf16.msra.mxu0 %v3159_v24 }
 0xa7e   : > { %2828 = vmatprep.subr.bf16.mxu1 %v3160_v25  ;;  %2850 = vmatprep.subr.bf16.mxu0 %v3161_v27  ;;  %v2739_v27 = vld [vmem:[%s779_s22] ss:$0 sm:$0xff] }
 0xa81   : > { %2829 = vmatpush3.bf16.msra.mxu1 %v3162_v28  ;;  %2851 = vmatpush3.bf16.msra.mxu0 %v3163_v29 }
 0xb37   : > { %v1955_v35 = vpop.f32.mrb[28].mxu1  ;;  %v1996_v36 = vpop.f32.mrb[16].mxu0 }
 0xb38   : > { %v1956_v37 = vadd.f32 %v1955_v35, %v1744_v0  ;;  %v1997_v38 = vadd.f32 %v1996_v36, %v1752_v32  ;;  %v1957_v39 = vpop.f32.mrb[29].mxu1  ;;  %v1998_v40 = vpop.f32.mrb[17].mxu0 }
 0xb39   : > { %v1958_v41 = vadd.f32 %v1957_v39, %v1748_v33  ;;  %v1999_v42 = vadd.f32 %v1998_v40, %v1756_v34  ;;  %v1959_v45 = vpop.f32.mrb[30].mxu1  ;;  %v2000_v47 = vpop.f32.mrb[18].mxu0 }
 0xb3a   : > { %v2007_v49 = vmul.f32 %v1956_v37, %v1956_v37  ;;  %v2009_v50 = vmul.f32 %v1997_v38, %v1997_v38  ;;  %v1960_v48 = vpop.f32.mrb[31].mxu1  ;;  %v2001_v51 = vpop.f32.mrb[19].mxu0  ;;  %v2003_v9 = vmul.f32 0.5, %v1956_v37  ;;  %v2005_v13 = vmul.f32 0.5, %v1997_v38 }
 0xb3b   : > { %v2008_v52 = vmul.f32 %v1958_v41, %v1958_v41  ;;  %v2010_v46 = vmul.f32 %v1999_v42, %v1999_v42  ;;  %v2004_v14 = vmul.f32 0.5, %v1958_v41  ;;  %v2006_v16 = vmul.f32 0.5, %v1999_v42  ;;  %v2774_v48 = vld [vmem:[%s4101_s27] ss:$0 sm:$0xff] (!%p2772_p0) }
 0xb3c   : > { %v2011_v53 = vmul.f32 %v2007_v49, %v1956_v37  ;;  %v2013_v43 = vmul.f32 %v2009_v50, %v1997_v38 }
 0xb3d   : > { %v2012_v44 = vmul.f32 %v2008_v52, %v1958_v41  ;;  %v2014_v54 = vmul.f32 %v2010_v46, %v1999_v42 }
 0xb3e   : > { %v2015_v55 = vmul.f32 0.044715, %v2011_v53  ;;  %v2017_v56 = vmul.f32 0.044715, %v2013_v43 }
 0xb3f   : > { %v2016_v57 = vmul.f32 0.044715, %v2012_v44  ;;  %v2018_v58 = vmul.f32 0.044715, %v2014_v54 }
 0xb40   : > { %v2019_v59 = vadd.f32 %v2015_v55, %v1956_v37  ;;  %v2021_v60 = vadd.f32 %v2017_v56, %v1997_v38 }
 0xb41   : > { %v2020_v61 = vadd.f32 %v2016_v57, %v1958_v41  ;;  %v2022_v62 = vadd.f32 %v2018_v58, %v1999_v42 }
 0xb42   : > { %v2023_v63 = vmul.f32 0.7978846, %v2019_v59  ;;  %v2025_v4 = vmul.f32 0.7978846, %v2021_v60 }
 0xb43   : > { %v2024_v2 = vmul.f32 0.7978846, %v2020_v61  ;;  %v2026_v3 = vmul.f32 0.7978846, %v2022_v62 }
 0xb44   : > { %3184 = vtanh.f32 %v2023_v63 }
 0xb45   : > { %3186 = vtanh.f32 %v2025_v4 }
 0xb46   : > { %3188 = vtanh.f32 %v2024_v2 }
 0xb47   : > { %3190 = vtanh.f32 %v2026_v3 }
 0xb4e   : > { %v3185_v5 = vpop.eup %3184 }
 0xb4f   : > { %v3187_v6 = vpop.eup %3186  ;;  %v2031_v7 = vadd.f32 1.0, %v3185_v5 }
 0xb50   : > { %v3189_v8 = vpop.eup %3188  ;;  %v2033_v12 = vadd.f32 1.0, %v3187_v6 }
 0xb51   : > { %v3191_v26 = vpop.eup %3190  ;;  %v2032_v15 = vadd.f32 1.0, %v3189_v8  ;;  %v2035_v17 = vmul.f32 %v2031_v7, %v2003_v9 }
 0xb52   : > { %v2034_v11 = vadd.f32 1.0, %v3191_v26  ;;  %v2037_v18 = vmul.f32 %v2033_v12, %v2005_v13 }
 0xb53   : > { %v2036_v1 = vmul.f32 %v2032_v15, %v2004_v14  ;;  %v2039_v22 = vpack.c.bf16 %v2035_v17, %v2035_v17 }
 0xb54   : > { %v2038_v19 = vmul.f32 %v2034_v11, %v2006_v16  ;;  %v2041_v23 = vpack.c.bf16 %v2037_v18, %v2037_v18 }
 0xb55   : > { %v2040_v20 = vpack.c.bf16 %v2036_v1, %v2036_v1 }
 0xb56   : > { %v2042_v21 = vpack.c.bf16 %v2038_v19, %v2038_v19 }
 0xb57   : > { %2338 = vmatprep.mubr.bf16.mxu1 %v2040_v20 }
 0xb58   : > { %2378 = vmatprep.mubr.bf16.mxu0 %v2042_v21  ;;  %2339 = vmatmul.mubr.bf16.vlgmr.msra.gmra.mrb[32].mxu1 %v2039_v22 }
 0xb59   : > { %2379 = vmatmul.mubr.bf16.vlgmr.msra.gmra.mrb[20].mxu0 %v2041_v23 }
 0xc2b   : > { %v2830_v24 = vpop.f32.mrb[32].mxu1 }
 0xc2c   : > { %v2852_v25 = vpop.f32.mrb[20].mxu0  ;;  %v2831_v28 = vpop.f32.mrb[33].mxu1 }
 0xc2d   : > { %v2832_v29 = vadd.f32 %v2831_v28, %v2830_v24  ;;  %v2853_v30 = vpop.f32.mrb[21].mxu0  ;;  %v2833_v31 = vpop.f32.mrb[34].mxu1 }
 0xc2e   : > { %v2854_v0 = vadd.f32 %v2853_v30, %v2852_v25  ;;  %v2855_v32 = vpop.f32.mrb[22].mxu0  ;;  %v2834_v33 = vpop.f32.mrb[35].mxu1 }
 0xc2f   : > { %v2341_v34 = vadd.f32 %v2832_v29, %v2739_v27  ;;  %v2856_v35 = vpop.f32.mrb[23].mxu0  ;;  %2391 = sbr.rel (%p2772_p0) target bundleno = 3437 (0xd6d), region = 104 }
 0xc31   : > { %v2381_v36 = vadd.f32 %v2854_v0, %v2341_v34 }
 0xc33   : > { %v2386_v37 = vadd.f32 %v2381_v36, %v3894_v10  ;;  %v2773_v10 = vld [vmem:[%s4100_s30] ss:$0 sm:$0xff] (!%p2772_p0) }
 0xc35   : > { %2387 = vst [vmem:[%s3719_s6] sm:$0xff] %v2386_v37  ;;  %2394 = vadd.xlane.f32.xlu0 (!%p2772_p0), %v2386_v37 }
 0xcc2   : > { %v2395_v38 = vpop.xlane.xlu0 %2394 }
 0xcc3   : > { %v2396_v39 = vmul.f32 0.0078125, %v2395_v38 }
 0xcc5   : > { %v2397_v40 = vsub.f32 %v2386_v37, %v2396_v39 }
 0xcc7   : > { %v2398_v41 = vmul.f32 %v2397_v40, %v2397_v40 }
 0xcc9   : > { %2399 = vadd.xlane.f32.xlu0 %v2398_v41 }
 0xd56   : > { %v2400_v42 = vpop.xlane.xlu0 %2399 }
 0xd57   : > { %v2401_v45 = vmul.f32 0.0078125, %v2400_v42 }
 0xd59   : > { %v2402_v47 = vadd.f32 1e-05, %v2401_v45 }
 0xd5b   : > { %3192 = vrsqrt.f32 %v2402_v47 }
 0xd65   : > { %v3193_v49 = vpop.eup %3192 }
 0xd66   : > { %v2404_v50 = vmul.f32 %v3193_v49, %v2397_v40 }
 0xd68   : > { %v2411_v51 = vmul.f32 %v2773_v10, %v2404_v50 }
 0xd6a   : > { %v2418_v52 = vadd.f32 %v2774_v48, %v2411_v51 }
 0xd6c   : > { %2419 = vst [vmem:[%s3719_s6] sm:$0xff] %v2418_v52 }
 0xd6d PF: > { %s4102_s28 = sld [smem:[#allocation15_spill]]  ;;  %s4103_s21 = sld [smem:[#allocation10_spill]] }
 0xd6e   : > { %s4104_s22 = sld [smem:[#allocation11_spill]]  ;;  %s4105_s23 = sld [smem:[#allocation18_spill]] }
 0xd6f   : > { %s4106_s24 = sld [smem:[#allocation13_spill]]  ;;  %s4107_s25 = sld [smem:[#allocation14_spill]] }
 0xd70   : > { %s4108_s26 = sld [smem:[#allocation16_spill]]  ;;  %s4109_s27 = sld [smem:[#allocation17_spill]] }
 0xd73   : > { %s32_s28 = sadd.s32 1, %s4102_s28  }
 0xd74   : > { %p29_p4 = scmp.ge.s32.totalorder %s32_s28, 6  }
 0xd76   :  { %31 = sbr.rel (!%p29_p4) target bundleno = 22 (0x16), region = 187 }
 0xd7d   :  { %2439 = vsyncpa [#allocation4], 1 }
 0xd7e   :  { %2441 = vsyncpa [#allocation4 + $0x1], 1 }
 0xd7f   :  { %2442 = vsyncpa [#allocation6], 1 }
 0xd80   :  { %2444 = vsyncpa [#allocation6 + $0x1], 1 }

</bundles_post_ra>
